<compile_context>
chip_gen: v7x
topology: tpu7x:2x2x1
jax: 0.10.0
libtpu: 0.0.40
codegen_flags: <defaults>
</compile_context>

<pallas_src>
import numpy as np
import jax
import jax.numpy as jnp
from jax.experimental import pallas as pl
from jax.experimental.pallas import tpu as pltpu

# ---------------------------------------------------------------------------
# Fixed HPF filter banks (identical literals to the module) - used by the
# pure-JAX reference below; the kernel hard-codes the factored algebra.
# ---------------------------------------------------------------------------
filter_class_1 = [
    np.array([[1, 0, 0], [0, -1, 0], [0, 0, 0]], dtype=np.float32),
    np.array([[0, 1, 0], [0, -1, 0], [0, 0, 0]], dtype=np.float32),
    np.array([[0, 0, 1], [0, -1, 0], [0, 0, 0]], dtype=np.float32),
    np.array([[0, 0, 0], [1, -1, 0], [0, 0, 0]], dtype=np.float32),
    np.array([[0, 0, 0], [0, -1, 1], [0, 0, 0]], dtype=np.float32),
    np.array([[0, 0, 0], [0, -1, 0], [1, 0, 0]], dtype=np.float32),
    np.array([[0, 0, 0], [0, -1, 0], [0, 1, 0]], dtype=np.float32),
    np.array([[0, 0, 0], [0, -1, 0], [0, 0, 1]], dtype=np.float32),
]
filter_class_2 = [
    np.array([[1, 0, 0], [0, -2, 0], [0, 0, 1]], dtype=np.float32),
    np.array([[0, 1, 0], [0, -2, 0], [0, 1, 0]], dtype=np.float32),
    np.array([[0, 0, 1], [0, -2, 0], [1, 0, 0]], dtype=np.float32),
    np.array([[0, 0, 0], [1, -2, 1], [0, 0, 0]], dtype=np.float32),
]
normalized_filter_class_2 = [hpf / 2 for hpf in filter_class_2]
filter_class_3 = [
    np.array([[3, 0, 0], [0, -3, 0], [0, 0, 1]], dtype=np.float32),
    np.array([[0, 3, 0], [0, -3, 0], [0, 1, 0]], dtype=np.float32),
    np.array([[0, 0, 3], [0, -3, 0], [1, 0, 0]], dtype=np.float32),
    np.array([[0, 0, 0], [1, -3, 3], [0, 0, 0]], dtype=np.float32),
    np.array([[1, 0, 0], [0, -3, 0], [0, 0, 3]], dtype=np.float32),
    np.array([[0, 1, 0], [0, -3, 0], [0, 3, 0]], dtype=np.float32),
    np.array([[0, 0, 1], [0, -3, 0], [3, 0, 0]], dtype=np.float32),
    np.array([[0, 0, 0], [3, -3, 1], [0, 0, 0]], dtype=np.float32),
]
normalized_filter_class_3 = [hpf / 3 for hpf in filter_class_3]
filter_edge_3x3 = [
    np.array([[-1, 2, -1], [2, -4, 2], [0, 0, 0]], dtype=np.float32),
    np.array([[0, 2, -1], [0, -4, 2], [0, 2, -1]], dtype=np.float32),
    np.array([[0, 0, 0], [2, -4, 2], [-1, 2, -1]], dtype=np.float32),
    np.array([[-1, 2, 0], [2, -4, 0], [-1, 2, 0]], dtype=np.float32),
]
normalized_filter_edge_3x3 = [hpf / 4 for hpf in filter_edge_3x3]
square_3x3 = np.array([[-1, 2, -1], [2, -4, 2], [-1, 2, -1]], dtype=np.float32)
normalized_square_3x3 = square_3x3 / 4
normalized_hpf_3x3_list = (filter_class_1 + normalized_filter_class_2 +
                           normalized_filter_class_3 + normalized_filter_edge_3x3 +
                           [normalized_square_3x3])

filter_edge_5x5 = [
    np.array([[-1, 2, -2, 2, -1], [2, -6, 8, -6, 2], [-2, 8, -12, 8, -2],
              [0, 0, 0, 0, 0], [0, 0, 0, 0, 0]], dtype=np.float32),
    np.array([[0, 0, -2, 2, -1], [0, 0, 8, -6, 2], [0, 0, -12, 8, -2],
              [0, 0, 8, -6, 2], [0, 0, -2, 2, -1]], dtype=np.float32),
    np.array([[0, 0, 0, 0, 0], [0, 0, 0, 0, 0], [-2, 8, -12, 8, -2],
              [2, -6, 8, -6, 2], [-1, 2, -2, 2, -1]], dtype=np.float32),
    np.array([[-1, 2, -2, 0, 0], [2, -6, 8, 0, 0], [-2, 8, -12, 0, 0],
              [2, -6, 8, 0, 0], [-1, 2, -2, 0, 0]], dtype=np.float32),
]
normalized_filter_edge_5x5 = [hpf / 12 for hpf in filter_edge_5x5]
square_5x5 = np.array([[-1, 2, -2, 2, -1], [2, -6, 8, -6, 2], [-2, 8, -12, 8, -2],
                       [2, -6, 8, -6, 2], [-1, 2, -2, 2, -1]], dtype=np.float32)
normalized_square_5x5 = square_5x5 / 12
normalized_hpf_5x5_list = normalized_filter_edge_5x5 + [normalized_square_5x5]

W3_NP = np.stack(normalized_hpf_3x3_list, axis=0).astype(np.float32)  # (25, 3, 3)
W5_NP = np.stack(normalized_hpf_5x5_list, axis=0).astype(np.float32)  # (5, 5, 5)


def _round_up(a, b):
    return (a + b - 1) // b * b


def _cdiv(a, b):
    return (a + b - 1) // b


def _vmem_limit_bytes():
    # Generation-aware: ~75% of physical VMEM (v5e/v6e 128 MiB -> 96 MiB,
    # v7x 64 MiB -> 48 MiB), clamped to [16, 96] MiB.
    try:
        cap = int(pltpu.get_tpu_info().vmem_capacity_bytes)
    except Exception:
        cap = 64 * 1024 * 1024     # conservative (v7x physical)
    return int(min(max(cap * 3 // 4, 16 * 1024 * 1024), 96 * 1024 * 1024))


# ---------------------------------------------------------------------------
# Kernel factory (all tile sizes static, closed over).
#   x_hbm : (N*Hp, Wp) padded planes, left in HBM (pl.ANY); halo DMA'd here.
#   o_ref : (1, 30, TH, Ws) lane-dense output row tile, ReLU applied.
#   buf   : (TH+8, Wp) VMEM halo slab, sem: DMA semaphore.
# ---------------------------------------------------------------------------
def _make_kernel(TH, Ws, Wp, Hp):
    HALO = TH + 8
    THIRD = 1.0 / 3.0
    S = 1.0 / 12.0

    def kernel(x_hbm, o_ref, buf, sem):
        n = pl.program_id(0)
        t = pl.program_id(1)
        row0 = pl.multiple_of(n * Hp + t * TH, 8)

        # Fetch only the halo slab this row tile needs (input VMEM = O(TH*Wp),
        # self-contained per step -> megacore safe; slab is <4% of the output
        # writeback so the exposed DMA is negligible).
        cp = pltpu.make_async_copy(x_hbm.at[pl.ds(row0, HALO), :], buf, sem)
        cp.start()
        cp.wait()
        base = buf[...]                                     # (TH+8, Wp)

        def shifted(dj):
            # shifted(dj)[r, x] == padded[row0 + r, x + dj] for every x < Wo
            # (roll wraparound only touches columns the wrapper crops away).
            r = base if dj == 0 else pltpu.roll(base, Wp - dj, axis=1)
            return r[:, :Ws]

        def rows(arr, di):                                  # (TH, Ws) window
            return arr[di:di + TH, :]

        def store(ch, v):
            o_ref[0, ch, :, :] = jnp.maximum(v, 0.0).astype(o_ref.dtype)

        P1, P2, P3 = shifted(1), shifted(2), shifted(3)

        # ---- channels 0..19 : 3x3 point filters (class 1 / 2 / 3) ---------
        c0 = rows(P2, 2)                                    # centre tap
        noff = [(1, P1), (1, P2), (1, P3), (2, P1), (2, P3),
                (3, P1), (3, P2), (3, P3)]
        nb = [rows(p, di) for di, p in noff]                # 8 neighbour taps
        r1 = [nb[i] - c0 for i in range(8)]                 # class-1 responses
        for i in range(8):
            store(i, r1[i])
        for k, (i, j) in enumerate(((0, 7), (1, 6), (2, 5), (3, 4))):
            store(8 + k, 0.5 * (r1[i] + r1[j]))             # class 2 = avg of class-1 pairs
        c3 = ((0, 7), (1, 6), (2, 5), (4, 3), (7, 0), (6, 1), (5, 2), (3, 4))
        for k, (i, j) in enumerate(c3):
            store(12 + k, r1[i] + THIRD * nb[j])            # class 3 = class-1 + tap/3

        # ---- channels 20..24 : 3x3 edge/square via 1-D row responses (/4) -
        q2 = 0.5 * P2
        dL = q2 - 0.25 * P1                                 # [-1, 2, 0]/4
        dR = q2 - 0.25 * P3                                 # [ 0, 2,-1]/4
        d = dL + dR - q2                                    # [-1, 2,-1]/4
        eL = 0.5 * P1 - P2                                  # [ 2,-4, 0]/4
        eR = 0.5 * P3 - P2                                  # [ 0,-4, 2]/4
        e = eL + eR + P2                                    # [ 2,-4, 2]/4
        store(21, rows(dR, 1) + rows(eR, 2) + rows(dR, 3))  # edge_3x3[1]
        store(23, rows(dL, 1) + rows(eL, 2) + rows(dL, 3))  # edge_3x3[3]
        d1, d3, e2 = rows(d, 1), rows(d, 3), rows(e, 2)
        s20 = d1 + e2
        store(20, s20)                                      # edge_3x3[0]
        store(22, e2 + d3)                                  # edge_3x3[2]
        store(24, s20 + d3)                                 # square_3x3

        # ---- channels 25..29 : 5x5 edge/square via 1-D row responses (/12) -
        P0, P4 = shifted(0), shifted(4)
        g2 = (2.0 * S) * P2
        g8 = (8.0 * S) * P2
        aL = (2.0 * S) * P1 - S * P0 - g2                   # [-1, 2,-2, 0, 0]/12
        aR = (2.0 * S) * P3 - S * P4 - g2                   # [ 0, 0,-2, 2,-1]/12
        a = aL + aR + g2                                    # [-1, 2,-2, 2,-1]/12
        bL = (2.0 * S) * P0 - (6.0 * S) * P1 + g8           # [ 2,-6, 8, 0, 0]/12
        bR = (2.0 * S) * P4 - (6.0 * S) * P3 + g8           # [ 0, 0, 8,-6, 2]/12
        b = bL + bR - g8                                    # [ 2,-6, 8,-6, 2]/12
        cL = (8.0 * S) * P1 - (2.0 * S) * P0 - P2           # [-2, 8,-12, 0, 0]/12
        cR = (8.0 * S) * P3 - (2.0 * S) * P4 - P2           # [ 0, 0,-12, 8,-2]/12
        c = cL + cR + P2                                    # [-2, 8,-12, 8,-2]/12
        store(26, rows(aR, 0) + rows(bR, 1) + rows(cR, 2)   # edge_5x5[1]
                  + rows(bR, 3) + rows(aR, 4))
        store(28, rows(aL, 0) + rows(bL, 1) + rows(cL, 2)   # edge_5x5[3]
                  + rows(bL, 3) + rows(aL, 4))
        s25 = rows(a, 0) + rows(b, 1) + rows(c, 2)
        t34 = rows(b, 3) + rows(a, 4)
        store(25, s25)                                      # edge_5x5[0]
        store(27, rows(c, 2) + t34)                         # edge_5x5[2]
        store(29, s25 + t34)                                # square_5x5

    return kernel


def hpf_forward(x, *, out_dtype=jnp.float32):
    """x: (N, 1, H, W) float32 NCHW -> (N, 30, H-2, W-2) NCHW (out_dtype)."""
    N, C, H, W = x.shape
    assert C == 1
    Ho, Wo = H - 2, W - 2
    assert Ho >= 1 and Wo >= 1

    Ws = _round_up(Wo, 128)          # lane-dense stored width
    Wp = _round_up(W + 2, 128)       # lane-aligned padded input width (>= W+2)

    # Row-tile sizing: per-step VMEM = halo slab + double-buffered output
    # block + ~LIVE live (TH, Ws) f32 intermediates, kept under a
    # generation-aware limit (v7x 48 MiB, v5e/v6e 96 MiB).
    limit = _vmem_limit_bytes()
    LIVE = 48                        # conservative live-intermediate count
    avail = int(limit * 0.80)        # headroom for Mosaic internal scratch
    per_row = 4 * (Wp + 2 * 30 * Ws + LIVE * Ws)
    fixed = 4 * 8 * (Wp + LIVE * Ws)
    cap = max(8, ((avail - fixed) // per_row) // 8 * 8)

    Ho8 = _round_up(Ho, 8)
    NT = _cdiv(Ho8, cap)
    if N * NT < 2 and Ho8 >= 16:
        NT = 2                       # keep both v7x TensorCores busy
    TH = _round_up(_cdiv(Ho8, NT), 8)
    NT = _cdiv(Ho8, TH)
    Hs = NT * TH                     # stored rows (exactly tiled by TH)
    Hp = Hs + 8                      # padded rows: covers H+2 and the halo

    # Single combined pad: conv zero-padding (+1) and lane/sublane alignment.
    xp = jnp.pad(x[:, 0, :, :].astype(jnp.float32),
                 ((0, 0), (1, Hp - H - 1), (1, Wp - W - 1)))
    xp = xp.reshape(N * Hp, Wp)      # flat rows -> one dynamic-ds halo DMA

    out = pl.pallas_call(
        _make_kernel(TH, Ws, Wp, Hp),
        out_shape=jax.ShapeDtypeStruct((N, 30, Hs, Ws), out_dtype),
        grid=(N, NT),
        in_specs=[pl.BlockSpec(memory_space=pl.ANY)],
        out_specs=pl.BlockSpec((1, 30, TH, Ws), lambda n, t: (n, 0, t, 0)),
        scratch_shapes=[pltpu.VMEM((TH + 8, Wp), jnp.float32),
                        pltpu.SemaphoreType.DMA],
        compiler_params=pltpu.CompilerParams(
            dimension_semantics=("parallel", "parallel"),
            vmem_limit_bytes=limit),
    )(xp)

    if Hs == Ho and Ws == Wo:
        return out                   # aligned shapes: no crop pass at all
    # TODO(synk): for non-aligned Ho/Wo a consumer could accept the padded
    # (Hs, Ws) layout (with pad lanes zeroed in-kernel) to skip this HBM pass.
    return out[:, :, :Ho, :Wo]


# Pure-JAX reference (matches the PyTorch forward exactly).
def hpf_ref(x):
    w3 = jnp.asarray(W3_NP).reshape(25, 1, 3, 3)
    w5 = jnp.asarray(W5_NP).reshape(5, 1, 5, 5)
    p3 = jax.lax.conv_general_dilated(x, w3, (1, 1), "VALID",
                                      dimension_numbers=("NCHW", "OIHW", "NCHW"))
    p5 = jax.lax.conv_general_dilated(x, w5, (1, 1), [(1, 1), (1, 1)],
                                      dimension_numbers=("NCHW", "OIHW", "NCHW"))
    return jax.nn.relu(jnp.concatenate([p3, p5], axis=1))


if __name__ == "__main__":
    key = jax.random.PRNGKey(0)
    x = jax.random.normal(key, (2, 1, 16, 16), dtype=jnp.float32)

    out = hpf_forward(x)
    out = jax.block_until_ready(out)

    ref = hpf_ref(x)
    assert out.shape == (2, 30, 14, 14), out.shape
    np.testing.assert_allclose(np.asarray(out), np.asarray(ref), atol=1e-4, rtol=1e-4)

    print("KERNEL_OK")
</pallas_src>

<mosaic_0001>
module attributes {stable_mosaic.version = 11 : i64} {
  func.func @kernel(%arg0: i32, %arg1: i32, %arg2: memref<48x128xf32, #tpu.memory_space<any>>, %arg3: memref<1x30x16x128xf32, #tpu.memory_space<vmem>>, %arg4: memref<24x128xf32, #tpu.memory_space<vmem>>, %arg5: memref<!tpu.dma_semaphore, #tpu.memory_space<semaphore_mem>>) attributes {dimension_semantics = [#tpu.dimension_semantics<parallel>, #tpu.dimension_semantics<parallel>], iteration_bounds = array<i64: 2, 1>, scalar_prefetch = 0 : i64, scratch_operands = 2 : i64, tpu.core_type = #tpu.core_type<tc>, window_params = [{}, {transform_indices = @transform_1, window_bounds = array<i64: 1, 30, 16, 128>}]} {
    %c24_i32 = arith.constant 24 : i32
    %0 = arith.muli %arg0, %c24_i32 : i32
    %c16_i32 = arith.constant 16 : i32
    %1 = arith.muli %arg1, %c16_i32 : i32
    %2 = arith.addi %0, %1 : i32
    %3 = tpu.assume_multiple %2, 8 : i32
    %c0_i32 = arith.constant 0 : i32
    %4 = tpu.memref_slice %arg2[%3, %c0_i32] : memref<48x128xf32, #tpu.memory_space<any>> -> memref<24x128xf32, #tpu.memory_space<any>>
    tpu.enqueue_dma source(%4 : memref<24x128xf32, #tpu.memory_space<any>>) target(%arg4 : memref<24x128xf32, #tpu.memory_space<vmem>>) target_semaphore(%arg5 : memref<!tpu.dma_semaphore, #tpu.memory_space<semaphore_mem>>)
    %c0_i32_0 = arith.constant 0 : i32
    %5 = tpu.memref_slice %arg2[%3, %c0_i32_0] : memref<48x128xf32, #tpu.memory_space<any>> -> memref<24x128xf32, #tpu.memory_space<any>>
    tpu.wait_dma2 semaphore(%arg5 : memref<!tpu.dma_semaphore, #tpu.memory_space<semaphore_mem>>) src(%5 : memref<24x128xf32, #tpu.memory_space<any>>) dst(%arg4 : memref<24x128xf32, #tpu.memory_space<vmem>>)
    %c0 = arith.constant 0 : index
    %c0_1 = arith.constant 0 : index
    %6 = vector.load %arg4[%c0, %c0_1] : memref<24x128xf32, #tpu.memory_space<vmem>>, vector<24x128xf32>
    %c127_i32 = arith.constant 127 : i32
    %7 = tpu.dynamic_rotate %6 by %c127_i32 dim 1 : vector<24x128xf32>, i32 -> vector<24x128xf32>
    %c126_i32 = arith.constant 126 : i32
    %8 = tpu.dynamic_rotate %6 by %c126_i32 dim 1 : vector<24x128xf32>, i32 -> vector<24x128xf32>
    %c125_i32 = arith.constant 125 : i32
    %9 = tpu.dynamic_rotate %6 by %c125_i32 dim 1 : vector<24x128xf32>, i32 -> vector<24x128xf32>
    %10 = vector.extract_strided_slice %8 {offsets = [2, 0], sizes = [16, 128], strides = [1, 1]} : vector<24x128xf32> to vector<16x128xf32>
    %11 = vector.extract_strided_slice %7 {offsets = [1, 0], sizes = [16, 128], strides = [1, 1]} : vector<24x128xf32> to vector<16x128xf32>
    %12 = vector.extract_strided_slice %8 {offsets = [1, 0], sizes = [16, 128], strides = [1, 1]} : vector<24x128xf32> to vector<16x128xf32>
    %13 = vector.extract_strided_slice %9 {offsets = [1, 0], sizes = [16, 128], strides = [1, 1]} : vector<24x128xf32> to vector<16x128xf32>
    %14 = vector.extract_strided_slice %7 {offsets = [2, 0], sizes = [16, 128], strides = [1, 1]} : vector<24x128xf32> to vector<16x128xf32>
    %15 = vector.extract_strided_slice %9 {offsets = [2, 0], sizes = [16, 128], strides = [1, 1]} : vector<24x128xf32> to vector<16x128xf32>
    %16 = vector.extract_strided_slice %7 {offsets = [3, 0], sizes = [16, 128], strides = [1, 1]} : vector<24x128xf32> to vector<16x128xf32>
    %17 = vector.extract_strided_slice %8 {offsets = [3, 0], sizes = [16, 128], strides = [1, 1]} : vector<24x128xf32> to vector<16x128xf32>
    %18 = vector.extract_strided_slice %9 {offsets = [3, 0], sizes = [16, 128], strides = [1, 1]} : vector<24x128xf32> to vector<16x128xf32>
    %19 = arith.subf %11, %10 : vector<16x128xf32>
    %20 = arith.subf %12, %10 : vector<16x128xf32>
    %21 = arith.subf %13, %10 : vector<16x128xf32>
    %22 = arith.subf %14, %10 : vector<16x128xf32>
    %23 = arith.subf %15, %10 : vector<16x128xf32>
    %24 = arith.subf %16, %10 : vector<16x128xf32>
    %25 = arith.subf %17, %10 : vector<16x128xf32>
    %26 = arith.subf %18, %10 : vector<16x128xf32>
    %cst = arith.constant 0.000000e+00 : f32
    %27 = vector.broadcast %cst : f32 to vector<16x128xf32>
    %28 = arith.maximumf %19, %27 : vector<16x128xf32>
    %c0_2 = arith.constant 0 : index
    %c0_3 = arith.constant 0 : index
    %c0_4 = arith.constant 0 : index
    %c0_5 = arith.constant 0 : index
    %29 = vector.load %arg3[%c0_2, %c0_3, %c0_4, %c0_5] : memref<1x30x16x128xf32, #tpu.memory_space<vmem>>, vector<1x1x16x128xf32>
    %30 = vector.shape_cast %29 : vector<1x1x16x128xf32> to vector<16x128xf32>
    %31 = vector.shape_cast %28 : vector<16x128xf32> to vector<1x1x16x128xf32>
    tpu.vector_store %arg3[%c0_2, %c0_3, %c0_4, %c0_5], %31 {strides = array<i32>} : memref<1x30x16x128xf32, #tpu.memory_space<vmem>>, vector<1x1x16x128xf32>,
    %cst_6 = arith.constant 0.000000e+00 : f32
    %32 = vector.broadcast %cst_6 : f32 to vector<16x128xf32>
    %33 = arith.maximumf %20, %32 : vector<16x128xf32>
    %c0_7 = arith.constant 0 : index
    %c1 = arith.constant 1 : index
    %c0_8 = arith.constant 0 : index
    %c0_9 = arith.constant 0 : index
    %34 = vector.load %arg3[%c0_7, %c1, %c0_8, %c0_9] : memref<1x30x16x128xf32, #tpu.memory_space<vmem>>, vector<1x1x16x128xf32>
    %35 = vector.shape_cast %34 : vector<1x1x16x128xf32> to vector<16x128xf32>
    %36 = vector.shape_cast %33 : vector<16x128xf32> to vector<1x1x16x128xf32>
    tpu.vector_store %arg3[%c0_7, %c1, %c0_8, %c0_9], %36 {strides = array<i32>} : memref<1x30x16x128xf32, #tpu.memory_space<vmem>>, vector<1x1x16x128xf32>,
    %cst_10 = arith.constant 0.000000e+00 : f32
    %37 = vector.broadcast %cst_10 : f32 to vector<16x128xf32>
    %38 = arith.maximumf %21, %37 : vector<16x128xf32>
    %c0_11 = arith.constant 0 : index
    %c2 = arith.constant 2 : index
    %c0_12 = arith.constant 0 : index
    %c0_13 = arith.constant 0 : index
    %39 = vector.load %arg3[%c0_11, %c2, %c0_12, %c0_13] : memref<1x30x16x128xf32, #tpu.memory_space<vmem>>, vector<1x1x16x128xf32>
    %40 = vector.shape_cast %39 : vector<1x1x16x128xf32> to vector<16x128xf32>
    %41 = vector.shape_cast %38 : vector<16x128xf32> to vector<1x1x16x128xf32>
    tpu.vector_store %arg3[%c0_11, %c2, %c0_12, %c0_13], %41 {strides = array<i32>} : memref<1x30x16x128xf32, #tpu.memory_space<vmem>>, vector<1x1x16x128xf32>,
    %cst_14 = arith.constant 0.000000e+00 : f32
    %42 = vector.broadcast %cst_14 : f32 to vector<16x128xf32>
    %43 = arith.maximumf %22, %42 : vector<16x128xf32>
    %c0_15 = arith.constant 0 : index
    %c3 = arith.constant 3 : index
    %c0_16 = arith.constant 0 : index
    %c0_17 = arith.constant 0 : index
    %44 = vector.load %arg3[%c0_15, %c3, %c0_16, %c0_17] : memref<1x30x16x128xf32, #tpu.memory_space<vmem>>, vector<1x1x16x128xf32>
    %45 = vector.shape_cast %44 : vector<1x1x16x128xf32> to vector<16x128xf32>
    %46 = vector.shape_cast %43 : vector<16x128xf32> to vector<1x1x16x128xf32>
    tpu.vector_store %arg3[%c0_15, %c3, %c0_16, %c0_17], %46 {strides = array<i32>} : memref<1x30x16x128xf32, #tpu.memory_space<vmem>>, vector<1x1x16x128xf32>,
    %cst_18 = arith.constant 0.000000e+00 : f32
    %47 = vector.broadcast %cst_18 : f32 to vector<16x128xf32>
    %48 = arith.maximumf %23, %47 : vector<16x128xf32>
    %c0_19 = arith.constant 0 : index
    %c4 = arith.constant 4 : index
    %c0_20 = arith.constant 0 : index
    %c0_21 = arith.constant 0 : index
    %49 = vector.load %arg3[%c0_19, %c4, %c0_20, %c0_21] : memref<1x30x16x128xf32, #tpu.memory_space<vmem>>, vector<1x1x16x128xf32>
    %50 = vector.shape_cast %49 : vector<1x1x16x128xf32> to vector<16x128xf32>
    %51 = vector.shape_cast %48 : vector<16x128xf32> to vector<1x1x16x128xf32>
    tpu.vector_store %arg3[%c0_19, %c4, %c0_20, %c0_21], %51 {strides = array<i32>} : memref<1x30x16x128xf32, #tpu.memory_space<vmem>>, vector<1x1x16x128xf32>,
    %cst_22 = arith.constant 0.000000e+00 : f32
    %52 = vector.broadcast %cst_22 : f32 to vector<16x128xf32>
    %53 = arith.maximumf %24, %52 : vector<16x128xf32>
    %c0_23 = arith.constant 0 : index
    %c5 = arith.constant 5 : index
    %c0_24 = arith.constant 0 : index
    %c0_25 = arith.constant 0 : index
    %54 = vector.load %arg3[%c0_23, %c5, %c0_24, %c0_25] : memref<1x30x16x128xf32, #tpu.memory_space<vmem>>, vector<1x1x16x128xf32>
    %55 = vector.shape_cast %54 : vector<1x1x16x128xf32> to vector<16x128xf32>
    %56 = vector.shape_cast %53 : vector<16x128xf32> to vector<1x1x16x128xf32>
    tpu.vector_store %arg3[%c0_23, %c5, %c0_24, %c0_25], %56 {strides = array<i32>} : memref<1x30x16x128xf32, #tpu.memory_space<vmem>>, vector<1x1x16x128xf32>,
    %cst_26 = arith.constant 0.000000e+00 : f32
    %57 = vector.broadcast %cst_26 : f32 to vector<16x128xf32>
    %58 = arith.maximumf %25, %57 : vector<16x128xf32>
    %c0_27 = arith.constant 0 : index
    %c6 = arith.constant 6 : index
    %c0_28 = arith.constant 0 : index
    %c0_29 = arith.constant 0 : index
    %59 = vector.load %arg3[%c0_27, %c6, %c0_28, %c0_29] : memref<1x30x16x128xf32, #tpu.memory_space<vmem>>, vector<1x1x16x128xf32>
    %60 = vector.shape_cast %59 : vector<1x1x16x128xf32> to vector<16x128xf32>
    %61 = vector.shape_cast %58 : vector<16x128xf32> to vector<1x1x16x128xf32>
    tpu.vector_store %arg3[%c0_27, %c6, %c0_28, %c0_29], %61 {strides = array<i32>} : memref<1x30x16x128xf32, #tpu.memory_space<vmem>>, vector<1x1x16x128xf32>,
    %cst_30 = arith.constant 0.000000e+00 : f32
    %62 = vector.broadcast %cst_30 : f32 to vector<16x128xf32>
    %63 = arith.maximumf %26, %62 : vector<16x128xf32>
    %c0_31 = arith.constant 0 : index
    %c7 = arith.constant 7 : index
    %c0_32 = arith.constant 0 : index
    %c0_33 = arith.constant 0 : index
    %64 = vector.load %arg3[%c0_31, %c7, %c0_32, %c0_33] : memref<1x30x16x128xf32, #tpu.memory_space<vmem>>, vector<1x1x16x128xf32>
    %65 = vector.shape_cast %64 : vector<1x1x16x128xf32> to vector<16x128xf32>
    %66 = vector.shape_cast %63 : vector<16x128xf32> to vector<1x1x16x128xf32>
    tpu.vector_store %arg3[%c0_31, %c7, %c0_32, %c0_33], %66 {strides = array<i32>} : memref<1x30x16x128xf32, #tpu.memory_space<vmem>>, vector<1x1x16x128xf32>,
    %67 = arith.addf %19, %26 : vector<16x128xf32>
    %cst_34 = arith.constant 5.000000e-01 : f32
    %68 = vector.broadcast %cst_34 : f32 to vector<16x128xf32>
    %69 = arith.mulf %68, %67 : vector<16x128xf32>
    %cst_35 = arith.constant 0.000000e+00 : f32
    %70 = vector.broadcast %cst_35 : f32 to vector<16x128xf32>
    %71 = arith.maximumf %69, %70 : vector<16x128xf32>
    %c0_36 = arith.constant 0 : index
    %c8 = arith.constant 8 : index
    %c0_37 = arith.constant 0 : index
    %c0_38 = arith.constant 0 : index
    %72 = vector.load %arg3[%c0_36, %c8, %c0_37, %c0_38] : memref<1x30x16x128xf32, #tpu.memory_space<vmem>>, vector<1x1x16x128xf32>
    %73 = vector.shape_cast %72 : vector<1x1x16x128xf32> to vector<16x128xf32>
    %74 = vector.shape_cast %71 : vector<16x128xf32> to vector<1x1x16x128xf32>
    tpu.vector_store %arg3[%c0_36, %c8, %c0_37, %c0_38], %74 {strides = array<i32>} : memref<1x30x16x128xf32, #tpu.memory_space<vmem>>, vector<1x1x16x128xf32>,
    %75 = arith.addf %20, %25 : vector<16x128xf32>
    %cst_39 = arith.constant 5.000000e-01 : f32
    %76 = vector.broadcast %cst_39 : f32 to vector<16x128xf32>
    %77 = arith.mulf %76, %75 : vector<16x128xf32>
    %cst_40 = arith.constant 0.000000e+00 : f32
    %78 = vector.broadcast %cst_40 : f32 to vector<16x128xf32>
    %79 = arith.maximumf %77, %78 : vector<16x128xf32>
    %c0_41 = arith.constant 0 : index
    %c9 = arith.constant 9 : index
    %c0_42 = arith.constant 0 : index
    %c0_43 = arith.constant 0 : index
    %80 = vector.load %arg3[%c0_41, %c9, %c0_42, %c0_43] : memref<1x30x16x128xf32, #tpu.memory_space<vmem>>, vector<1x1x16x128xf32>
    %81 = vector.shape_cast %80 : vector<1x1x16x128xf32> to vector<16x128xf32>
    %82 = vector.shape_cast %79 : vector<16x128xf32> to vector<1x1x16x128xf32>
    tpu.vector_store %arg3[%c0_41, %c9, %c0_42, %c0_43], %82 {strides = array<i32>} : memref<1x30x16x128xf32, #tpu.memory_space<vmem>>, vector<1x1x16x128xf32>,
    %83 = arith.addf %21, %24 : vector<16x128xf32>
    %cst_44 = arith.constant 5.000000e-01 : f32
    %84 = vector.broadcast %cst_44 : f32 to vector<16x128xf32>
    %85 = arith.mulf %84, %83 : vector<16x128xf32>
    %cst_45 = arith.constant 0.000000e+00 : f32
    %86 = vector.broadcast %cst_45 : f32 to vector<16x128xf32>
    %87 = arith.maximumf %85, %86 : vector<16x128xf32>
    %c0_46 = arith.constant 0 : index
    %c10 = arith.constant 10 : index
    %c0_47 = arith.constant 0 : index
    %c0_48 = arith.constant 0 : index
    %88 = vector.load %arg3[%c0_46, %c10, %c0_47, %c0_48] : memref<1x30x16x128xf32, #tpu.memory_space<vmem>>, vector<1x1x16x128xf32>
    %89 = vector.shape_cast %88 : vector<1x1x16x128xf32> to vector<16x128xf32>
    %90 = vector.shape_cast %87 : vector<16x128xf32> to vector<1x1x16x128xf32>
    tpu.vector_store %arg3[%c0_46, %c10, %c0_47, %c0_48], %90 {strides = array<i32>} : memref<1x30x16x128xf32, #tpu.memory_space<vmem>>, vector<1x1x16x128xf32>,
    %91 = arith.addf %22, %23 : vector<16x128xf32>
    %cst_49 = arith.constant 5.000000e-01 : f32
    %92 = vector.broadcast %cst_49 : f32 to vector<16x128xf32>
    %93 = arith.mulf %92, %91 : vector<16x128xf32>
    %cst_50 = arith.constant 0.000000e+00 : f32
    %94 = vector.broadcast %cst_50 : f32 to vector<16x128xf32>
    %95 = arith.maximumf %93, %94 : vector<16x128xf32>
    %c0_51 = arith.constant 0 : index
    %c11 = arith.constant 11 : index
    %c0_52 = arith.constant 0 : index
    %c0_53 = arith.constant 0 : index
    %96 = vector.load %arg3[%c0_51, %c11, %c0_52, %c0_53] : memref<1x30x16x128xf32, #tpu.memory_space<vmem>>, vector<1x1x16x128xf32>
    %97 = vector.shape_cast %96 : vector<1x1x16x128xf32> to vector<16x128xf32>
    %98 = vector.shape_cast %95 : vector<16x128xf32> to vector<1x1x16x128xf32>
    tpu.vector_store %arg3[%c0_51, %c11, %c0_52, %c0_53], %98 {strides = array<i32>} : memref<1x30x16x128xf32, #tpu.memory_space<vmem>>, vector<1x1x16x128xf32>,
    %cst_54 = arith.constant 0.333333343 : f32
    %99 = vector.broadcast %cst_54 : f32 to vector<16x128xf32>
    %100 = arith.mulf %99, %18 : vector<16x128xf32>
    %101 = arith.addf %19, %100 : vector<16x128xf32>
    %cst_55 = arith.constant 0.000000e+00 : f32
    %102 = vector.broadcast %cst_55 : f32 to vector<16x128xf32>
    %103 = arith.maximumf %101, %102 : vector<16x128xf32>
    %c0_56 = arith.constant 0 : index
    %c12 = arith.constant 12 : index
    %c0_57 = arith.constant 0 : index
    %c0_58 = arith.constant 0 : index
    %104 = vector.load %arg3[%c0_56, %c12, %c0_57, %c0_58] : memref<1x30x16x128xf32, #tpu.memory_space<vmem>>, vector<1x1x16x128xf32>
    %105 = vector.shape_cast %104 : vector<1x1x16x128xf32> to vector<16x128xf32>
    %106 = vector.shape_cast %103 : vector<16x128xf32> to vector<1x1x16x128xf32>
    tpu.vector_store %arg3[%c0_56, %c12, %c0_57, %c0_58], %106 {strides = array<i32>} : memref<1x30x16x128xf32, #tpu.memory_space<vmem>>, vector<1x1x16x128xf32>,
    %cst_59 = arith.constant 0.333333343 : f32
    %107 = vector.broadcast %cst_59 : f32 to vector<16x128xf32>
    %108 = arith.mulf %107, %17 : vector<16x128xf32>
    %109 = arith.addf %20, %108 : vector<16x128xf32>
    %cst_60 = arith.constant 0.000000e+00 : f32
    %110 = vector.broadcast %cst_60 : f32 to vector<16x128xf32>
    %111 = arith.maximumf %109, %110 : vector<16x128xf32>
    %c0_61 = arith.constant 0 : index
    %c13 = arith.constant 13 : index
    %c0_62 = arith.constant 0 : index
    %c0_63 = arith.constant 0 : index
    %112 = vector.load %arg3[%c0_61, %c13, %c0_62, %c0_63] : memref<1x30x16x128xf32, #tpu.memory_space<vmem>>, vector<1x1x16x128xf32>
    %113 = vector.shape_cast %112 : vector<1x1x16x128xf32> to vector<16x128xf32>
    %114 = vector.shape_cast %111 : vector<16x128xf32> to vector<1x1x16x128xf32>
    tpu.vector_store %arg3[%c0_61, %c13, %c0_62, %c0_63], %114 {strides = array<i32>} : memref<1x30x16x128xf32, #tpu.memory_space<vmem>>, vector<1x1x16x128xf32>,
    %cst_64 = arith.constant 0.333333343 : f32
    %115 = vector.broadcast %cst_64 : f32 to vector<16x128xf32>
    %116 = arith.mulf %115, %16 : vector<16x128xf32>
    %117 = arith.addf %21, %116 : vector<16x128xf32>
    %cst_65 = arith.constant 0.000000e+00 : f32
    %118 = vector.broadcast %cst_65 : f32 to vector<16x128xf32>
    %119 = arith.maximumf %117, %118 : vector<16x128xf32>
    %c0_66 = arith.constant 0 : index
    %c14 = arith.constant 14 : index
    %c0_67 = arith.constant 0 : index
    %c0_68 = arith.constant 0 : index
    %120 = vector.load %arg3[%c0_66, %c14, %c0_67, %c0_68] : memref<1x30x16x128xf32, #tpu.memory_space<vmem>>, vector<1x1x16x128xf32>
    %121 = vector.shape_cast %120 : vector<1x1x16x128xf32> to vector<16x128xf32>
    %122 = vector.shape_cast %119 : vector<16x128xf32> to vector<1x1x16x128xf32>
    tpu.vector_store %arg3[%c0_66, %c14, %c0_67, %c0_68], %122 {strides = array<i32>} : memref<1x30x16x128xf32, #tpu.memory_space<vmem>>, vector<1x1x16x128xf32>,
    %cst_69 = arith.constant 0.333333343 : f32
    %123 = vector.broadcast %cst_69 : f32 to vector<16x128xf32>
    %124 = arith.mulf %123, %14 : vector<16x128xf32>
    %125 = arith.addf %23, %124 : vector<16x128xf32>
    %cst_70 = arith.constant 0.000000e+00 : f32
    %126 = vector.broadcast %cst_70 : f32 to vector<16x128xf32>
    %127 = arith.maximumf %125, %126 : vector<16x128xf32>
    %c0_71 = arith.constant 0 : index
    %c15 = arith.constant 15 : index
    %c0_72 = arith.constant 0 : index
    %c0_73 = arith.constant 0 : index
    %128 = vector.load %arg3[%c0_71, %c15, %c0_72, %c0_73] : memref<1x30x16x128xf32, #tpu.memory_space<vmem>>, vector<1x1x16x128xf32>
    %129 = vector.shape_cast %128 : vector<1x1x16x128xf32> to vector<16x128xf32>
    %130 = vector.shape_cast %127 : vector<16x128xf32> to vector<1x1x16x128xf32>
    tpu.vector_store %arg3[%c0_71, %c15, %c0_72, %c0_73], %130 {strides = array<i32>} : memref<1x30x16x128xf32, #tpu.memory_space<vmem>>, vector<1x1x16x128xf32>,
    %cst_74 = arith.constant 0.333333343 : f32
    %131 = vector.broadcast %cst_74 : f32 to vector<16x128xf32>
    %132 = arith.mulf %131, %11 : vector<16x128xf32>
    %133 = arith.addf %26, %132 : vector<16x128xf32>
    %cst_75 = arith.constant 0.000000e+00 : f32
    %134 = vector.broadcast %cst_75 : f32 to vector<16x128xf32>
    %135 = arith.maximumf %133, %134 : vector<16x128xf32>
    %c0_76 = arith.constant 0 : index
    %c16 = arith.constant 16 : index
    %c0_77 = arith.constant 0 : index
    %c0_78 = arith.constant 0 : index
    %136 = vector.load %arg3[%c0_76, %c16, %c0_77, %c0_78] : memref<1x30x16x128xf32, #tpu.memory_space<vmem>>, vector<1x1x16x128xf32>
    %137 = vector.shape_cast %136 : vector<1x1x16x128xf32> to vector<16x128xf32>
    %138 = vector.shape_cast %135 : vector<16x128xf32> to vector<1x1x16x128xf32>
    tpu.vector_store %arg3[%c0_76, %c16, %c0_77, %c0_78], %138 {strides = array<i32>} : memref<1x30x16x128xf32, #tpu.memory_space<vmem>>, vector<1x1x16x128xf32>,
    %cst_79 = arith.constant 0.333333343 : f32
    %139 = vector.broadcast %cst_79 : f32 to vector<16x128xf32>
    %140 = arith.mulf %139, %12 : vector<16x128xf32>
    %141 = arith.addf %25, %140 : vector<16x128xf32>
    %cst_80 = arith.constant 0.000000e+00 : f32
    %142 = vector.broadcast %cst_80 : f32 to vector<16x128xf32>
    %143 = arith.maximumf %141, %142 : vector<16x128xf32>
    %c0_81 = arith.constant 0 : index
    %c17 = arith.constant 17 : index
    %c0_82 = arith.constant 0 : index
    %c0_83 = arith.constant 0 : index
    %144 = vector.load %arg3[%c0_81, %c17, %c0_82, %c0_83] : memref<1x30x16x128xf32, #tpu.memory_space<vmem>>, vector<1x1x16x128xf32>
    %145 = vector.shape_cast %144 : vector<1x1x16x128xf32> to vector<16x128xf32>
    %146 = vector.shape_cast %143 : vector<16x128xf32> to vector<1x1x16x128xf32>
    tpu.vector_store %arg3[%c0_81, %c17, %c0_82, %c0_83], %146 {strides = array<i32>} : memref<1x30x16x128xf32, #tpu.memory_space<vmem>>, vector<1x1x16x128xf32>,
    %cst_84 = arith.constant 0.333333343 : f32
    %147 = vector.broadcast %cst_84 : f32 to vector<16x128xf32>
    %148 = arith.mulf %147, %13 : vector<16x128xf32>
    %149 = arith.addf %24, %148 : vector<16x128xf32>
    %cst_85 = arith.constant 0.000000e+00 : f32
    %150 = vector.broadcast %cst_85 : f32 to vector<16x128xf32>
    %151 = arith.maximumf %149, %150 : vector<16x128xf32>
    %c0_86 = arith.constant 0 : index
    %c18 = arith.constant 18 : index
    %c0_87 = arith.constant 0 : index
    %c0_88 = arith.constant 0 : index
    %152 = vector.load %arg3[%c0_86, %c18, %c0_87, %c0_88] : memref<1x30x16x128xf32, #tpu.memory_space<vmem>>, vector<1x1x16x128xf32>
    %153 = vector.shape_cast %152 : vector<1x1x16x128xf32> to vector<16x128xf32>
    %154 = vector.shape_cast %151 : vector<16x128xf32> to vector<1x1x16x128xf32>
    tpu.vector_store %arg3[%c0_86, %c18, %c0_87, %c0_88], %154 {strides = array<i32>} : memref<1x30x16x128xf32, #tpu.memory_space<vmem>>, vector<1x1x16x128xf32>,
    %cst_89 = arith.constant 0.333333343 : f32
    %155 = vector.broadcast %cst_89 : f32 to vector<16x128xf32>
    %156 = arith.mulf %155, %15 : vector<16x128xf32>
    %157 = arith.addf %22, %156 : vector<16x128xf32>
    %cst_90 = arith.constant 0.000000e+00 : f32
    %158 = vector.broadcast %cst_90 : f32 to vector<16x128xf32>
    %159 = arith.maximumf %157, %158 : vector<16x128xf32>
    %c0_91 = arith.constant 0 : index
    %c19 = arith.constant 19 : index
    %c0_92 = arith.constant 0 : index
    %c0_93 = arith.constant 0 : index
    %160 = vector.load %arg3[%c0_91, %c19, %c0_92, %c0_93] : memref<1x30x16x128xf32, #tpu.memory_space<vmem>>, vector<1x1x16x128xf32>
    %161 = vector.shape_cast %160 : vector<1x1x16x128xf32> to vector<16x128xf32>
    %162 = vector.shape_cast %159 : vector<16x128xf32> to vector<1x1x16x128xf32>
    tpu.vector_store %arg3[%c0_91, %c19, %c0_92, %c0_93], %162 {strides = array<i32>} : memref<1x30x16x128xf32, #tpu.memory_space<vmem>>, vector<1x1x16x128xf32>,
    %cst_94 = arith.constant 5.000000e-01 : f32
    %163 = vector.broadcast %cst_94 : f32 to vector<24x128xf32>
    %164 = arith.mulf %163, %8 : vector<24x128xf32>
    %cst_95 = arith.constant 2.500000e-01 : f32
    %165 = vector.broadcast %cst_95 : f32 to vector<24x128xf32>
    %166 = arith.mulf %165, %7 : vector<24x128xf32>
    %167 = arith.subf %164, %166 : vector<24x128xf32>
    %cst_96 = arith.constant 2.500000e-01 : f32
    %168 = vector.broadcast %cst_96 : f32 to vector<24x128xf32>
    %169 = arith.mulf %168, %9 : vector<24x128xf32>
    %170 = arith.subf %164, %169 : vector<24x128xf32>
    %171 = arith.addf %167, %170 : vector<24x128xf32>
    %172 = arith.subf %171, %164 : vector<24x128xf32>
    %cst_97 = arith.constant 5.000000e-01 : f32
    %173 = vector.broadcast %cst_97 : f32 to vector<24x128xf32>
    %174 = arith.mulf %173, %7 : vector<24x128xf32>
    %175 = arith.subf %174, %8 : vector<24x128xf32>
    %cst_98 = arith.constant 5.000000e-01 : f32
    %176 = vector.broadcast %cst_98 : f32 to vector<24x128xf32>
    %177 = arith.mulf %176, %9 : vector<24x128xf32>
    %178 = arith.subf %177, %8 : vector<24x128xf32>
    %179 = arith.addf %175, %178 : vector<24x128xf32>
    %180 = arith.addf %179, %8 : vector<24x128xf32>
    %181 = vector.extract_strided_slice %170 {offsets = [1, 0], sizes = [16, 128], strides = [1, 1]} : vector<24x128xf32> to vector<16x128xf32>
    %182 = vector.extract_strided_slice %178 {offsets = [2, 0], sizes = [16, 128], strides = [1, 1]} : vector<24x128xf32> to vector<16x128xf32>
    %183 = arith.addf %181, %182 : vector<16x128xf32>
    %184 = vector.extract_strided_slice %170 {offsets = [3, 0], sizes = [16, 128], strides = [1, 1]} : vector<24x128xf32> to vector<16x128xf32>
    %185 = arith.addf %183, %184 : vector<16x128xf32>
    %cst_99 = arith.constant 0.000000e+00 : f32
    %186 = vector.broadcast %cst_99 : f32 to vector<16x128xf32>
    %187 = arith.maximumf %185, %186 : vector<16x128xf32>
    %c0_100 = arith.constant 0 : index
    %c21 = arith.constant 21 : index
    %c0_101 = arith.constant 0 : index
    %c0_102 = arith.constant 0 : index
    %188 = vector.load %arg3[%c0_100, %c21, %c0_101, %c0_102] : memref<1x30x16x128xf32, #tpu.memory_space<vmem>>, vector<1x1x16x128xf32>
    %189 = vector.shape_cast %188 : vector<1x1x16x128xf32> to vector<16x128xf32>
    %190 = vector.shape_cast %187 : vector<16x128xf32> to vector<1x1x16x128xf32>
    tpu.vector_store %arg3[%c0_100, %c21, %c0_101, %c0_102], %190 {strides = array<i32>} : memref<1x30x16x128xf32, #tpu.memory_space<vmem>>, vector<1x1x16x128xf32>,
    %191 = vector.extract_strided_slice %167 {offsets = [1, 0], sizes = [16, 128], strides = [1, 1]} : vector<24x128xf32> to vector<16x128xf32>
    %192 = vector.extract_strided_slice %175 {offsets = [2, 0], sizes = [16, 128], strides = [1, 1]} : vector<24x128xf32> to vector<16x128xf32>
    %193 = arith.addf %191, %192 : vector<16x128xf32>
    %194 = vector.extract_strided_slice %167 {offsets = [3, 0], sizes = [16, 128], strides = [1, 1]} : vector<24x128xf32> to vector<16x128xf32>
    %195 = arith.addf %193, %194 : vector<16x128xf32>
    %cst_103 = arith.constant 0.000000e+00 : f32
    %196 = vector.broadcast %cst_103 : f32 to vector<16x128xf32>
    %197 = arith.maximumf %195, %196 : vector<16x128xf32>
    %c0_104 = arith.constant 0 : index
    %c23 = arith.constant 23 : index
    %c0_105 = arith.constant 0 : index
    %c0_106 = arith.constant 0 : index
    %198 = vector.load %arg3[%c0_104, %c23, %c0_105, %c0_106] : memref<1x30x16x128xf32, #tpu.memory_space<vmem>>, vector<1x1x16x128xf32>
    %199 = vector.shape_cast %198 : vector<1x1x16x128xf32> to vector<16x128xf32>
    %200 = vector.shape_cast %197 : vector<16x128xf32> to vector<1x1x16x128xf32>
    tpu.vector_store %arg3[%c0_104, %c23, %c0_105, %c0_106], %200 {strides = array<i32>} : memref<1x30x16x128xf32, #tpu.memory_space<vmem>>, vector<1x1x16x128xf32>,
    %201 = vector.extract_strided_slice %172 {offsets = [1, 0], sizes = [16, 128], strides = [1, 1]} : vector<24x128xf32> to vector<16x128xf32>
    %202 = vector.extract_strided_slice %172 {offsets = [3, 0], sizes = [16, 128], strides = [1, 1]} : vector<24x128xf32> to vector<16x128xf32>
    %203 = vector.extract_strided_slice %180 {offsets = [2, 0], sizes = [16, 128], strides = [1, 1]} : vector<24x128xf32> to vector<16x128xf32>
    %204 = arith.addf %201, %203 : vector<16x128xf32>
    %cst_107 = arith.constant 0.000000e+00 : f32
    %205 = vector.broadcast %cst_107 : f32 to vector<16x128xf32>
    %206 = arith.maximumf %204, %205 : vector<16x128xf32>
    %c0_108 = arith.constant 0 : index
    %c20 = arith.constant 20 : index
    %c0_109 = arith.constant 0 : index
    %c0_110 = arith.constant 0 : index
    %207 = vector.load %arg3[%c0_108, %c20, %c0_109, %c0_110] : memref<1x30x16x128xf32, #tpu.memory_space<vmem>>, vector<1x1x16x128xf32>
    %208 = vector.shape_cast %207 : vector<1x1x16x128xf32> to vector<16x128xf32>
    %209 = vector.shape_cast %206 : vector<16x128xf32> to vector<1x1x16x128xf32>
    tpu.vector_store %arg3[%c0_108, %c20, %c0_109, %c0_110], %209 {strides = array<i32>} : memref<1x30x16x128xf32, #tpu.memory_space<vmem>>, vector<1x1x16x128xf32>,
    %210 = arith.addf %203, %202 : vector<16x128xf32>
    %cst_111 = arith.constant 0.000000e+00 : f32
    %211 = vector.broadcast %cst_111 : f32 to vector<16x128xf32>
    %212 = arith.maximumf %210, %211 : vector<16x128xf32>
    %c0_112 = arith.constant 0 : index
    %c22 = arith.constant 22 : index
    %c0_113 = arith.constant 0 : index
    %c0_114 = arith.constant 0 : index
    %213 = vector.load %arg3[%c0_112, %c22, %c0_113, %c0_114] : memref<1x30x16x128xf32, #tpu.memory_space<vmem>>, vector<1x1x16x128xf32>
    %214 = vector.shape_cast %213 : vector<1x1x16x128xf32> to vector<16x128xf32>
    %215 = vector.shape_cast %212 : vector<16x128xf32> to vector<1x1x16x128xf32>
    tpu.vector_store %arg3[%c0_112, %c22, %c0_113, %c0_114], %215 {strides = array<i32>} : memref<1x30x16x128xf32, #tpu.memory_space<vmem>>, vector<1x1x16x128xf32>,
    %216 = arith.addf %204, %202 : vector<16x128xf32>
    %cst_115 = arith.constant 0.000000e+00 : f32
    %217 = vector.broadcast %cst_115 : f32 to vector<16x128xf32>
    %218 = arith.maximumf %216, %217 : vector<16x128xf32>
    %c0_116 = arith.constant 0 : index
    %c24 = arith.constant 24 : index
    %c0_117 = arith.constant 0 : index
    %c0_118 = arith.constant 0 : index
    %219 = vector.load %arg3[%c0_116, %c24, %c0_117, %c0_118] : memref<1x30x16x128xf32, #tpu.memory_space<vmem>>, vector<1x1x16x128xf32>
    %220 = vector.shape_cast %219 : vector<1x1x16x128xf32> to vector<16x128xf32>
    %221 = vector.shape_cast %218 : vector<16x128xf32> to vector<1x1x16x128xf32>
    tpu.vector_store %arg3[%c0_116, %c24, %c0_117, %c0_118], %221 {strides = array<i32>} : memref<1x30x16x128xf32, #tpu.memory_space<vmem>>, vector<1x1x16x128xf32>,
    %c124_i32 = arith.constant 124 : i32
    %222 = tpu.dynamic_rotate %6 by %c124_i32 dim 1 : vector<24x128xf32>, i32 -> vector<24x128xf32>
    %cst_119 = arith.constant 0.166666672 : f32
    %223 = vector.broadcast %cst_119 : f32 to vector<24x128xf32>
    %224 = arith.mulf %223, %8 : vector<24x128xf32>
    %cst_120 = arith.constant 0.666666686 : f32
    %225 = vector.broadcast %cst_120 : f32 to vector<24x128xf32>
    %226 = arith.mulf %225, %8 : vector<24x128xf32>
    %cst_121 = arith.constant 0.166666672 : f32
    %227 = vector.broadcast %cst_121 : f32 to vector<24x128xf32>
    %228 = arith.mulf %227, %7 : vector<24x128xf32>
    %cst_122 = arith.constant 0.0833333358 : f32
    %229 = vector.broadcast %cst_122 : f32 to vector<24x128xf32>
    %230 = arith.mulf %229, %6 : vector<24x128xf32>
    %231 = arith.subf %228, %230 : vector<24x128xf32>
    %232 = arith.subf %231, %224 : vector<24x128xf32>
    %cst_123 = arith.constant 0.166666672 : f32
    %233 = vector.broadcast %cst_123 : f32 to vector<24x128xf32>
    %234 = arith.mulf %233, %9 : vector<24x128xf32>
    %cst_124 = arith.constant 0.0833333358 : f32
    %235 = vector.broadcast %cst_124 : f32 to vector<24x128xf32>
    %236 = arith.mulf %235, %222 : vector<24x128xf32>
    %237 = arith.subf %234, %236 : vector<24x128xf32>
    %238 = arith.subf %237, %224 : vector<24x128xf32>
    %239 = arith.addf %232, %238 : vector<24x128xf32>
    %240 = arith.addf %239, %224 : vector<24x128xf32>
    %cst_125 = arith.constant 0.166666672 : f32
    %241 = vector.broadcast %cst_125 : f32 to vector<24x128xf32>
    %242 = arith.mulf %241, %6 : vector<24x128xf32>
    %cst_126 = arith.constant 5.000000e-01 : f32
    %243 = vector.broadcast %cst_126 : f32 to vector<24x128xf32>
    %244 = arith.mulf %243, %7 : vector<24x128xf32>
    %245 = arith.subf %242, %244 : vector<24x128xf32>
    %246 = arith.addf %245, %226 : vector<24x128xf32>
    %cst_127 = arith.constant 0.166666672 : f32
    %247 = vector.broadcast %cst_127 : f32 to vector<24x128xf32>
    %248 = arith.mulf %247, %222 : vector<24x128xf32>
    %cst_128 = arith.constant 5.000000e-01 : f32
    %249 = vector.broadcast %cst_128 : f32 to vector<24x128xf32>
    %250 = arith.mulf %249, %9 : vector<24x128xf32>
    %251 = arith.subf %248, %250 : vector<24x128xf32>
    %252 = arith.addf %251, %226 : vector<24x128xf32>
    %253 = arith.addf %246, %252 : vector<24x128xf32>
    %254 = arith.subf %253, %226 : vector<24x128xf32>
    %cst_129 = arith.constant 0.666666686 : f32
    %255 = vector.broadcast %cst_129 : f32 to vector<24x128xf32>
    %256 = arith.mulf %255, %7 : vector<24x128xf32>
    %cst_130 = arith.constant 0.166666672 : f32
    %257 = vector.broadcast %cst_130 : f32 to vector<24x128xf32>
    %258 = arith.mulf %257, %6 : vector<24x128xf32>
    %259 = arith.subf %256, %258 : vector<24x128xf32>
    %260 = arith.subf %259, %8 : vector<24x128xf32>
    %cst_131 = arith.constant 0.666666686 : f32
    %261 = vector.broadcast %cst_131 : f32 to vector<24x128xf32>
    %262 = arith.mulf %261, %9 : vector<24x128xf32>
    %cst_132 = arith.constant 0.166666672 : f32
    %263 = vector.broadcast %cst_132 : f32 to vector<24x128xf32>
    %264 = arith.mulf %263, %222 : vector<24x128xf32>
    %265 = arith.subf %262, %264 : vector<24x128xf32>
    %266 = arith.subf %265, %8 : vector<24x128xf32>
    %267 = arith.addf %260, %266 : vector<24x128xf32>
    %268 = arith.addf %267, %8 : vector<24x128xf32>
    %269 = vector.extract_strided_slice %238 {offsets = [0, 0], sizes = [16, 128], strides = [1, 1]} : vector<24x128xf32> to vector<16x128xf32>
    %270 = vector.extract_strided_slice %252 {offsets = [1, 0], sizes = [16, 128], strides = [1, 1]} : vector<24x128xf32> to vector<16x128xf32>
    %271 = arith.addf %269, %270 : vector<16x128xf32>
    %272 = vector.extract_strided_slice %266 {offsets = [2, 0], sizes = [16, 128], strides = [1, 1]} : vector<24x128xf32> to vector<16x128xf32>
    %273 = arith.addf %271, %272 : vector<16x128xf32>
    %274 = vector.extract_strided_slice %252 {offsets = [3, 0], sizes = [16, 128], strides = [1, 1]} : vector<24x128xf32> to vector<16x128xf32>
    %275 = arith.addf %273, %274 : vector<16x128xf32>
    %276 = vector.extract_strided_slice %238 {offsets = [4, 0], sizes = [16, 128], strides = [1, 1]} : vector<24x128xf32> to vector<16x128xf32>
    %277 = arith.addf %275, %276 : vector<16x128xf32>
    %cst_133 = arith.constant 0.000000e+00 : f32
    %278 = vector.broadcast %cst_133 : f32 to vector<16x128xf32>
    %279 = arith.maximumf %277, %278 : vector<16x128xf32>
    %c0_134 = arith.constant 0 : index
    %c26 = arith.constant 26 : index
    %c0_135 = arith.constant 0 : index
    %c0_136 = arith.constant 0 : index
    %280 = vector.load %arg3[%c0_134, %c26, %c0_135, %c0_136] : memref<1x30x16x128xf32, #tpu.memory_space<vmem>>, vector<1x1x16x128xf32>
    %281 = vector.shape_cast %280 : vector<1x1x16x128xf32> to vector<16x128xf32>
    %282 = vector.shape_cast %279 : vector<16x128xf32> to vector<1x1x16x128xf32>
    tpu.vector_store %arg3[%c0_134, %c26, %c0_135, %c0_136], %282 {strides = array<i32>} : memref<1x30x16x128xf32, #tpu.memory_space<vmem>>, vector<1x1x16x128xf32>,
    %283 = vector.extract_strided_slice %232 {offsets = [0, 0], sizes = [16, 128], strides = [1, 1]} : vector<24x128xf32> to vector<16x128xf32>
    %284 = vector.extract_strided_slice %246 {offsets = [1, 0], sizes = [16, 128], strides = [1, 1]} : vector<24x128xf32> to vector<16x128xf32>
    %285 = arith.addf %283, %284 : vector<16x128xf32>
    %286 = vector.extract_strided_slice %260 {offsets = [2, 0], sizes = [16, 128], strides = [1, 1]} : vector<24x128xf32> to vector<16x128xf32>
    %287 = arith.addf %285, %286 : vector<16x128xf32>
    %288 = vector.extract_strided_slice %246 {offsets = [3, 0], sizes = [16, 128], strides = [1, 1]} : vector<24x128xf32> to vector<16x128xf32>
    %289 = arith.addf %287, %288 : vector<16x128xf32>
    %290 = vector.extract_strided_slice %232 {offsets = [4, 0], sizes = [16, 128], strides = [1, 1]} : vector<24x128xf32> to vector<16x128xf32>
    %291 = arith.addf %289, %290 : vector<16x128xf32>
    %cst_137 = arith.constant 0.000000e+00 : f32
    %292 = vector.broadcast %cst_137 : f32 to vector<16x128xf32>
    %293 = arith.maximumf %291, %292 : vector<16x128xf32>
    %c0_138 = arith.constant 0 : index
    %c28 = arith.constant 28 : index
    %c0_139 = arith.constant 0 : index
    %c0_140 = arith.constant 0 : index
    %294 = vector.load %arg3[%c0_138, %c28, %c0_139, %c0_140] : memref<1x30x16x128xf32, #tpu.memory_space<vmem>>, vector<1x1x16x128xf32>
    %295 = vector.shape_cast %294 : vector<1x1x16x128xf32> to vector<16x128xf32>
    %296 = vector.shape_cast %293 : vector<16x128xf32> to vector<1x1x16x128xf32>
    tpu.vector_store %arg3[%c0_138, %c28, %c0_139, %c0_140], %296 {strides = array<i32>} : memref<1x30x16x128xf32, #tpu.memory_space<vmem>>, vector<1x1x16x128xf32>,
    %297 = vector.extract_strided_slice %240 {offsets = [0, 0], sizes = [16, 128], strides = [1, 1]} : vector<24x128xf32> to vector<16x128xf32>
    %298 = vector.extract_strided_slice %254 {offsets = [1, 0], sizes = [16, 128], strides = [1, 1]} : vector<24x128xf32> to vector<16x128xf32>
    %299 = arith.addf %297, %298 : vector<16x128xf32>
    %300 = vector.extract_strided_slice %268 {offsets = [2, 0], sizes = [16, 128], strides = [1, 1]} : vector<24x128xf32> to vector<16x128xf32>
    %301 = arith.addf %299, %300 : vector<16x128xf32>
    %302 = vector.extract_strided_slice %254 {offsets = [3, 0], sizes = [16, 128], strides = [1, 1]} : vector<24x128xf32> to vector<16x128xf32>
    %303 = vector.extract_strided_slice %240 {offsets = [4, 0], sizes = [16, 128], strides = [1, 1]} : vector<24x128xf32> to vector<16x128xf32>
    %304 = arith.addf %302, %303 : vector<16x128xf32>
    %cst_141 = arith.constant 0.000000e+00 : f32
    %305 = vector.broadcast %cst_141 : f32 to vector<16x128xf32>
    %306 = arith.maximumf %301, %305 : vector<16x128xf32>
    %c0_142 = arith.constant 0 : index
    %c25 = arith.constant 25 : index
    %c0_143 = arith.constant 0 : index
    %c0_144 = arith.constant 0 : index
    %307 = vector.load %arg3[%c0_142, %c25, %c0_143, %c0_144] : memref<1x30x16x128xf32, #tpu.memory_space<vmem>>, vector<1x1x16x128xf32>
    %308 = vector.shape_cast %307 : vector<1x1x16x128xf32> to vector<16x128xf32>
    %309 = vector.shape_cast %306 : vector<16x128xf32> to vector<1x1x16x128xf32>
    tpu.vector_store %arg3[%c0_142, %c25, %c0_143, %c0_144], %309 {strides = array<i32>} : memref<1x30x16x128xf32, #tpu.memory_space<vmem>>, vector<1x1x16x128xf32>,
    %310 = vector.extract_strided_slice %268 {offsets = [2, 0], sizes = [16, 128], strides = [1, 1]} : vector<24x128xf32> to vector<16x128xf32>
    %311 = arith.addf %310, %304 : vector<16x128xf32>
    %cst_145 = arith.constant 0.000000e+00 : f32
    %312 = vector.broadcast %cst_145 : f32 to vector<16x128xf32>
    %313 = arith.maximumf %311, %312 : vector<16x128xf32>
    %c0_146 = arith.constant 0 : index
    %c27 = arith.constant 27 : index
    %c0_147 = arith.constant 0 : index
    %c0_148 = arith.constant 0 : index
    %314 = vector.load %arg3[%c0_146, %c27, %c0_147, %c0_148] : memref<1x30x16x128xf32, #tpu.memory_space<vmem>>, vector<1x1x16x128xf32>
    %315 = vector.shape_cast %314 : vector<1x1x16x128xf32> to vector<16x128xf32>
    %316 = vector.shape_cast %313 : vector<16x128xf32> to vector<1x1x16x128xf32>
    tpu.vector_store %arg3[%c0_146, %c27, %c0_147, %c0_148], %316 {strides = array<i32>} : memref<1x30x16x128xf32, #tpu.memory_space<vmem>>, vector<1x1x16x128xf32>,
    %317 = arith.addf %301, %304 : vector<16x128xf32>
    %cst_149 = arith.constant 0.000000e+00 : f32
    %318 = vector.broadcast %cst_149 : f32 to vector<16x128xf32>
    %319 = arith.maximumf %317, %318 : vector<16x128xf32>
    %c0_150 = arith.constant 0 : index
    %c29 = arith.constant 29 : index
    %c0_151 = arith.constant 0 : index
    %c0_152 = arith.constant 0 : index
    %320 = vector.load %arg3[%c0_150, %c29, %c0_151, %c0_152] : memref<1x30x16x128xf32, #tpu.memory_space<vmem>>, vector<1x1x16x128xf32>
    %321 = vector.shape_cast %320 : vector<1x1x16x128xf32> to vector<16x128xf32>
    %322 = vector.shape_cast %319 : vector<16x128xf32> to vector<1x1x16x128xf32>
    tpu.vector_store %arg3[%c0_150, %c29, %c0_151, %c0_152], %322 {strides = array<i32>} : memref<1x30x16x128xf32, #tpu.memory_space<vmem>>, vector<1x1x16x128xf32>,
    return
  }
  func.func @transform_1(%arg0: i32, %arg1: i32) -> (i32, i32, i32, i32) {
    %c0_i32 = arith.constant 0 : i32
    %c0_i32_0 = arith.constant 0 : i32
    %c0_i32_1 = arith.constant 0 : i32
    return %arg0, %c0_i32, %arg1, %c0_i32_0 : i32, i32, i32, i32
  }
}

</mosaic_0001>

<bundles_post_ra>
// kernel: tpu_custom_call.1
= control target key start
LH: loop header
LB: loop body
LE: loop exit
PB: predicated region body
PF: predicated region fallthrough
CT: control target
= control target key end

     0   :  { %6 = vsyncpa [#allocation5], 0  ;;  %s2171_s0 = inlined_call_operand.hbm [shape: f32[48,128], index: 0, kind: input, shape index: {}]   ;;  %s2172_s1 = inlined_call_operand.hbm [shape: f32[2,30,16,128], index: 1, kind: output, shape index: {}]  }
   0x1   :  { %8 = vsyncpa [#allocation5 + $0x1], 0  ;;  %s1199_s6 = smov 0   ;;  %s1201_s7 = smov 0  }
   0x2   :  { %s1203_s8 = smov 0   ;;  %s1205_s9 = smov 0  }
   0x3 LB: > { %s23_s10 = sadd.s32 1, %s1175_s8  ;;  %s951_s11 = sadd.s32 4294967295, %s1179_s9   ;;  %s1179_s9 = sphi %s1205_s9, %s14_s9   ;;  %s1175_s8 = sphi %s1203_s8, %s2348_s8   ;;  %s1171_s7 = sphi %s1201_s7, %s2347_s7   ;;  %s1167_s6 = sphi %s1199_s6, %s2346_s6  }
   0x4   : > { %p25_p0 = scmp.ge.s32.totalorder %s23_s10, 2  ;;  %p41_p1 = scmp.ne.s32.totalorder %s1171_s7, %s1167_s6 }
   0x5   : > { %s32_s12 = sadd.s32 1, %s1171_s7  ;;  %p42_p2 = scmp.eq.s32.totalorder %s951_s11, 1 }
   0x6   : > { %s2350_s10 = smov (%p25_p0, %s23_s10), 0  ;;  %p36_p3 = scmp.eq.s32.totalorder %s1179_s9, 1 }
   0x7   : > { %s27_s13 = ssub.s32 %s1175_s8, %s2350_s10  ;;  %p1229_p6 = por %p42_p2, %p41_p1 }
   0x8   : > { %p30_p4 = scmp.eq.s32.totalorder %s27_s13, 0  ;;  %p952_p5 = scmp.ne.s32.totalorder %s27_s13, 0 }
   0x9   : > { %p953_p8 = scmp.ge.s32.totalorder %s1179_s9, 2 }
   0xa   : > { %s1234_s15 = scalar_select %p30_p4, %s1171_s7, %s32_s12  }
   0xb   : > { %p1236_p7 = por %p952_p5, %p36_p3  ;;  %51 = sbr.rel (%p953_p8) target bundleno = 311 (0x137), region = 12 }
  0x12   : > { %s56_s17 = sand.u32 1, %s1171_s7   ;;  %s1042_s18 = smul.u32 384, %s1175_s8 }
  0x13   : > { %s1043_s19 = smul.u32 480, %s56_s17  ;;  %s1181_s23 = smov [#allocation2]  }
  0x14   : > { %s64_s22 = scalar_lea.hbm %s2171_s0, %s1042_s18  ;;  %s72_s24 = sshll.u32 %s1181_s23, 4  ;;  %s73_s24 = int_to_ptr.vmem [resolvable:$true] %s72_s24 }
  0x15   : > { %s1091_s25 = scalar_lea.hbm %s64_s22, 384  ;;  %s1093_s28 = scalar_lea.hbm %s2171_s0, 768 }
  0x16   : > { %p1092_p9 = scmp.ne.s32.totalorder %s64_s22, %s1091_s25  ;;  %p1094_p10 = scmp.lt.u32.totalorder %s64_s22, %s2171_s0 }
  0x17   : > { %p1095_p11 = scmp.lt.u32.totalorder %s1093_s28, %s1091_s25  ;;  %p1097_p13 = scmp.lt.u32.totalorder %s1091_s25, %s64_s22 }
  0x19   : > { %p1096_p12 = por %p1095_p11, %p1094_p10 }
  0x1b   : > { %p1098_p0 = por %p1097_p13, %p1096_p12 }
  0x1d   : > { %p1099_p1 = pnand %p1098_p0, %p1092_p9 }
  0x1f   : > { %1102 = shalt.err (!%p1099_p1)  }
  0x20   : > { %s1103_s2 = scalar_lea.vmem %s73_s24, 384  ;;  %p1108_p3 = scmp.lt.s32.totalorder %s73_s24, %s73_s24 }
  0x21   : > { %p1104_p2 = scmp.ne.s32.totalorder %s73_s24, %s1103_s2  ;;  %p1109_p4 = scmp.lt.s32.totalorder %s1103_s2, %s1103_s2 }
  0x23   : > { %p1110_p5 = por %p1109_p4, %p1108_p3 }
  0x25   : > { %p1111_p8 = pnand %p1110_p5, %p1104_p2 }
  0x27   : > { %1114 = shalt.err (!%p1111_p8)  }
  0x28   : > { %75 = dma.hbm_to_vmem [thread:$0]  %s64_s22, 384, %s73_s24, [#allocation3] }
  0x29   : > { %s1254_s3 = scalar_lea.vmem [#allocation4], %s1043_s19 }
  0x2a   : > { %1159 = dma.done.wait [#allocation3], 384 }
  0x2b   : > { %1160 = vsyncadd [#allocation3], 4294966912  ;;  %v81_v0 = vld [vmem:[#allocation2 + $0x10] sm:$0xff]  ;;  %v79_v1 = vld [vmem:[#allocation2] sm:$0xff]  ;;  %s1182_s4 = smov 127   ;;  %s1183_s5 = smov 125  }
  0x2c   : > { %86 = vrot.lane.b32.xlu1 %v81_v0, %s1182_s4  ;;  %82 = vrot.lane.b32.xlu0 %v79_v1, %s1182_s4  ;;  %v80_v2 = vld [vmem:[#allocation2 + $0x8] sm:$0xff]  ;;  %s1184_s11 = smov 124   ;;  %s1185_s12 = smov 126   ;;  %v1256_v3 = vmul.f32 0.083333336, %v81_v0  ;;  %vm203_vm0 = vcmask 1045504  }
  0x2d   : > { %v1258_v4 = vmul.f32 0.16666667, %v81_v0  ;;  %v1260_v5 = vmul.f32 0.083333336, %v79_v1  ;;  %v1262_v6 = vmul.f32 0.16666667, %v79_v1 }
  0x2e   : > { %v1264_v7 = vmul.f32 0.083333336, %v80_v2  ;;  %v1266_v8 = vmul.f32 0.16666667, %v80_v2  ;;  %vm368_vm1 = vcmask 1041408   ;;  %vm103_vm2 = vcmask 1046528  }
  0x2f   : > { %vm127_vm3 = vcmask 1040384   ;;  %vm716_vm4 = vcmask 1044480   ;;  %vm729_vm5 = vcmask 1043456   ;;  %s1044_s13 = smul.u32 7680, %s1175_s8  ;;  %s888_s18 = sshll.u32 %s1254_s3, 4  ;;  %s2123_s18 = int_to_ptr.vmem [resolvable:$true] %s888_s18 }
  0x30   : > { %94 = vrot.lane.b32.xlu1 %v79_v1, %s1183_s5  ;;  %84 = vrot.lane.b32.xlu0 %v80_v2, %s1182_s4  ;;  %2225 = vst [vmem:[#allocation12_spill] sm:$0xff] %v1264_v7  ;;  %2226 = vst [vmem:[#allocation13_spill] sm:$0xff] %v1266_v8  ;;  %s2131_s21 = scalar_lea.sflag [#allocation5], %s56_s17  ;;  %s1115_s22 = scalar_lea.vmem %s2123_s18, 7680 }
  0x31   : > { %s2121_s20 = scalar_lea.hbm %s2172_s1, %s1044_s13  ;;  %p1116_p9 = scmp.ne.s32.totalorder %s2123_s18, %s1115_s22 }
  0x32   : > { %s1186_s23 = smov [#allocation4]  }
  0x33   : > { %p1117_p10 = pnand %p1116_p9, %p1236_p7  ;;  %s1119_s24 = sshll.u32 %s1186_s23, 4  ;;  %s1120_s24 = int_to_ptr.vmem [resolvable:$false] %s1119_s24 }
  0x34   : > { %98 = vrot.lane.b32.xlu1 %v81_v0, %s1183_s5  ;;  %96 = vrot.lane.b32.xlu0 %v80_v2, %s1183_s5  ;;  %s1121_s25 = scalar_lea.vmem %s1120_s24, 15360  ;;  %p1122_p12 = scmp.lt.s32.totalorder %s2123_s18, %s1120_s24 }
  0x35   : > { %p1118_p11 = pneg %p1117_p10  ;;  %p1123_p13 = scmp.lt.s32.totalorder %s1121_s25, %s1115_s22 }
  0x37   : > { %p1124_p0 = por %p1123_p13, %p1122_p12 }
  0x38   : > { %604 = vrot.lane.b32.xlu1 %v80_v2, %s1184_s11  ;;  %602 = vrot.lane.b32.xlu0 %v79_v1, %s1184_s11 }
  0x39   : > { %p1125_p1 = pnand %p1124_p0, %p1118_p11 }
  0x3c   : > { %88 = vrot.lane.b32.xlu1 %v79_v1, %s1185_s12  ;;  %606 = vrot.lane.b32.xlu0 %v81_v0, %s1184_s11 }
  0x40   : > { %92 = vrot.lane.b32.xlu1 %v81_v0, %s1185_s12  ;;  %90 = vrot.lane.b32.xlu0 %v80_v2, %s1185_s12 }
  0x9e   : > { %v1268_v9 = vpop.permute.xlu1 %86  ;;  %v1270_v10 = vpop.permute.xlu0 %82 }
  0x9f   : > { %v1273_v11 = vmul.f32 0.33333334, %v1268_v9  ;;  %v1276_v12 = vmul.f32 0.5, %v1268_v9  ;;  %v1279_v13 = vmul.f32 0.16666667, %v1268_v9  ;;  %v1288_v16 = vmul.f32 0.5, %v1270_v10 }
  0xa0   : > { %v1282_v14 = vmul.f32 0.6666667, %v1268_v9  ;;  %v1285_v15 = vmul.f32 0.33333334, %v1270_v10  ;;  %v1293_v19 = vmul.f32 0.25, %v1268_v9  ;;  %v1296_v20 = vmul.f32 0.25, %v1270_v10 }
  0xa1   : > { %v2173_v17 = vrot.slane %v1273_v11, 2  ;;  %v372_v18 = vrot.slane %v1273_v11, 6  ;;  %v1305_v24 = vmul.f32 0.16666667, %v1270_v10  ;;  %v1315_v29 = vmul.f32 0.6666667, %v1270_v10 }
  0xa2   : > { %v1307_v25 = vpop.permute.xlu1 %94  ;;  %v1309_v26 = vpop.permute.xlu0 %84  ;;  %v340_v27 = vrot.slane %v1285_v15, 2  ;;  %v2175_v31 = vrot.slane %v1285_v15, 6 }
  0xa3   : > { %v1318_v30 = vmul.f32 0.33333334, %v1307_v25  ;;  %v1324_v33 = vmul.f32 0.33333334, %v1309_v26  ;;  %v1327_v34 = vmul.f32 0.5, %v1309_v26  ;;  %v1332_v36 = vmul.f32 0.25, %v1307_v25 }
  0xa4   : > { %v1335_v37 = vmul.f32 0.25, %v1309_v26  ;;  %v1338_v38 = vmul.f32 0.16666667, %v1309_v26  ;;  %v1344_v42 = vmul.f32 0.6666667, %v1309_v26  ;;  %v1421_v51 = vmul.f32 0.5, %v1307_v25 }
  0xa5   : > { %v292_v39 = vrot.slane %v1318_v30, 2  ;;  %v341_v40 = vrot.slane %v1324_v33, 2  ;;  %v370_v41 = vrot.slane %v1324_v33, 6  ;;  %v405_v45 = vrot.slane %v1318_v30, 6 }
  0xa6   : > { %2227 = vst [vmem:[#allocation14_spill] sm:$0xff] %v1335_v37  ;;  %2228 = vst [vmem:[#allocation15_spill] sm:$0xff] %v1338_v38  ;;  %v1346_v43 = vpop.permute.xlu1 %98  ;;  %v1348_v44 = vpop.permute.xlu0 %96  ;;  %v626_v46 = vmul.f32 0.16666667, %v1307_v25  ;;  %v2235_v38 = vrot.slane %v1285_v15, 6 }
  0xa7   : > { %2229 = vst [vmem:[#allocation16_spill] sm:$0xff] %v1344_v42  ;;  %v1354_v47 = vmul.f32 0.33333334, %v1346_v43  ;;  %v1357_v48 = vmul.f32 0.33333334, %v1348_v44  ;;  %v1360_v49 = vsel %vm203_vm0, %v340_v27, %v341_v40  ;;  %v1365_v50 = vsel %vm203_vm0, %v341_v40, %v2173_v17 }
  0xa8   : > { %v1370_v52 = vmul.f32 0.25, %v1346_v43  ;;  %v1380_v57 = vsel %vm368_vm1, %v2175_v31, %v370_v41  ;;  %v1384_v59 = vmul.f32 0.25, %v1348_v44  ;;  %v1387_v61 = vmul.f32 0.5, %v1348_v44 }
  0xa9   : > { %v2174_v54 = vrot.slane %v1354_v47, 2  ;;  %v408_v55 = vrot.slane %v1354_v47, 6  ;;  %v293_v56 = vrot.slane %v1357_v48, 2  ;;  %v406_v58 = vrot.slane %v1357_v48, 6 }
  0xaa   : > { %2230 = vst [vmem:[#allocation17_spill] sm:$0xff] %v1384_v59  ;;  %v605_v60 = vpop.permute.xlu1 %604  ;;  %v1390_v62 = vsel %vm368_vm1, %v370_v41, %v372_v18  ;;  %v1393_v63 = vmul.f32 0.16666667, %v1348_v44  ;;  %v603_v2 = vpop.permute.xlu0 %602  ;;  %v1411_v18 = vmul.f32 0.6666667, %v1348_v44 }
  0xab   : > { %v1395_v0 = vmul.f32 0.083333336, %v605_v60  ;;  %v1397_v1 = vmul.f32 0.16666667, %v605_v60  ;;  %v1400_v27 = vsel %vm203_vm0, %v292_v39, %v293_v56  ;;  %v1405_v40 = vsel %vm203_vm0, %v293_v56, %v2174_v54 }
  0xac   : > { %2231 = vst [vmem:[#allocation18_spill] sm:$0xff] %v1393_v63  ;;  %v1408_v53 = vsel %vm368_vm1, %v405_v45, %v406_v58  ;;  %2234 = vst [vmem:[#allocation21_spill] sm:$0xff] %v1411_v18  ;;  %v1414_v41 = vsel %vm368_vm1, %v406_v58, %v408_v55  ;;  %v629_v23 = vmul.f32 0.083333336, %v603_v2  ;;  %v653_v22 = vmul.f32 0.16666667, %v603_v2 }
  0xad   : > { %2232 = vst [vmem:[#allocation19_spill] sm:$0xff] %v1395_v0  ;;  %2233 = vst [vmem:[#allocation20_spill] sm:$0xff] %v1397_v1  ;;  %v677_v55 = vmul.f32 0.6666667, %v1307_v25  ;;  %v1441_v54 = vmul.f32 0.5, %v1346_v43 }
  0xae   : > { %v1426_v21 = vpop.permute.xlu1 %88  ;;  %v632_v17 = vsub.f32 %v626_v46, %v629_v23  ;;  %v656_v56 = vsub.f32 %v653_v22, %v1421_v51 }
  0xaf   : > { %v121_v58 = vsub.f32 %v1270_v10, %v1426_v21  ;;  %v124_v39 = vsub.f32 %v1307_v25, %v1426_v21  ;;  %v1434_v60 = vrot.slane %v1426_v21, 7  ;;  %v1438_v2 = vmul.f32 0.33333334, %v1426_v21 }
  0xb0   : > { %v680_v42 = vsub.f32 %v677_v55, %v653_v22  ;;  %v607_v55 = vpop.permute.xlu0 %606 }
  0xb1   : > { %v1445_v28 = vsub.f32 %v1270_v10, %v1434_v60  ;;  %v1449_v35 = vsub.f32 %v1426_v21, %v1434_v60  ;;  %v1453_v23 = vsub.f32 %v1307_v25, %v1434_v60  ;;  %v165_v46 = vmax.f32 %v121_v58, 0.0 }
  0xb2   : > { %v172_v32 = vmax.f32 %v124_v39, 0.0  ;;  %v273_v31 = vadd.f32 %v124_v39, %v121_v58  ;;  %v358_v18 = vadd.f32 %v1285_v15, %v124_v39  ;;  %v423_v39 = vadd.f32 %v1318_v30, %v121_v58 }
  0xb3   : > { %961 = vst [vmem:[%s1254_s3 + $0x2e] sm:$0xfc] %v165_v46  ;;  %v179_v1 = vmax.f32 %v1445_v28, 0.0  ;;  %v186_v8 = vmax.f32 %v1449_v35, 0.0  ;;  %v193_v0 = vmax.f32 %v1453_v23, 0.0  ;;  %v377_v59 = vadd.f32 %v2235_v38, %v1453_v23 }
  0xb4   : > { %964 = vst [vmem:[%s1254_s3 + $0x3e] sm:$0xfc] %v172_v32  ;;  %v276_v63 = vmul.f32 0.5, %v273_v31  ;;  %v361_v7 = vmax.f32 %v358_v18, 0.0  ;;  %v413_v37 = vadd.f32 %v405_v45, %v1445_v28  ;;  %v1473_v31 = vsub.f32 %v1288_v16, %v1426_v21 }
  0xb5   : > { %967 = vst [vmem:[%s1254_s3 + $0x4d] sm:$0xf8] %v179_v1  ;;  %970 = vst [vmem:[%s1254_s3 + $0x5d] sm:$0xf8] %v186_v8  ;;  %v1477_v15 = vsub.f32 %v1421_v51, %v1426_v21  ;;  %v380_v8 = vmax.f32 %v377_v59, 0.0  ;;  %v426_v1 = vmax.f32 %v423_v39, 0.0 }
  0xb6   : > { %973 = vst [vmem:[%s1254_s3 + $0x6d] sm:$0xf8] %v193_v0  ;;  %2236 = vst [vmem:[#allocation22_spill] sm:$0xff] %v1473_v31  ;;  %v279_v32 = vmax.f32 %v276_v63, 0.0  ;;  %v416_v38 = vmax.f32 %v413_v37, 0.0  ;;  %v1485_v30 = vmul.f32 0.5, %v1426_v21  ;;  %v2239_v37 = vsub.f32 %v1305_v24, %v1260_v5  ;;  %v1517_v24 = vpop.permute.xlu1 %92 }
  0xb7   : > { %2237 = vst [vmem:[#allocation23_spill] sm:$0xff] %v1477_v15  ;;  %997 = vst [vmem:[%s1254_s3 + $0xee] sm:$0xfc] %v361_v7  ;;  %v1481_v45 = vmul.f32 0.16666667, %v1426_v21  ;;  %v466_v18 = vadd.f32 %v1477_v15, %v1473_v31  ;;  %v2241_v63 = vsub.f32 %v1315_v29, %v1262_v6  ;;  %v1515_v5 = vsub.f32 %v680_v42, %v1426_v21 }
  0xb8   : > { %985 = vst [vmem:[%s1254_s3 + $0xae] sm:$0xfc] %v279_v32  ;;  %1000 = vst [vmem:[%s1254_s3 + $0xfd] sm:$0xf8] %v380_v8  ;;  %v611_v7 = vmul.f32 0.6666667, %v1426_v21 }
  0xb9   : > { %2238 = vst [vmem:[#allocation24_spill] sm:$0xff] %v1481_v45  ;;  %1006 = vst [vmem:[%s1254_s3 + $0x11d] sm:$0xf8] %v416_v38  ;;  %v1497_v51 = vsub.f32 %v2239_v37, %v1481_v45  ;;  %v1500_v59 = vsub.f32 %v632_v17, %v1481_v45  ;;  %v1506_v58 = vsub.f32 %v2241_v63, %v1426_v21  ;;  %v1527_v38 = vmul.f32 0.16666667, %v1346_v43 }
  0xba   : > { %1009 = vst [vmem:[%s1254_s3 + $0x12e] sm:$0xfc] %v426_v1  ;;  %v1510_v46 = vadd.f32 %v466_v18, %v1426_v21  ;;  %2244 = vst [vmem:[#allocation28_spill] sm:$0xff] %v1515_v5  ;;  %v2245_v17 = vsub.f32 %v1262_v6, %v1288_v16  ;;  %v1524_v29 = vadd.f32 %v656_v56, %v611_v7  ;;  %v1529_v1 = vmul.f32 0.083333336, %v607_v55 }
  0xbb   : > { %2240 = vst [vmem:[#allocation25_spill] sm:$0xff] %v1497_v51  ;;  %2242 = vst [vmem:[#allocation26_spill] sm:$0xff] %v1506_v58  ;;  %v686_v18 = vadd.f32 %v1515_v5, %v1506_v58  ;;  %v1535_v37 = vmul.f32 0.6666667, %v1346_v43  ;;  %v1537_v63 = vmul.f32 0.16666667, %v607_v55  ;;  %v126_v6 = vsub.f32 %v1346_v43, %v1517_v24 }
  0xbc   : > { %2243 = vst [vmem:[#allocation27_spill] sm:$0xff] %v1510_v46  ;;  %v1522_v8 = vadd.f32 %v2245_v17, %v611_v7  ;;  %2247 = vst [vmem:[#allocation30_spill] sm:$0xff] %v1524_v29  ;;  %v1543_v56 = vrot.slane %v1517_v24, 1  ;;  %v123_v17 = vsub.f32 %v1268_v9, %v1517_v24  ;;  %v634_v55 = vsub.f32 %v1527_v38, %v1529_v1 }
  0xbd   : > { %v1548_v39 = vadd.f32 %v686_v18, %v1426_v21  ;;  %v658_v38 = vsub.f32 %v1537_v63, %v1441_v54  ;;  %v2250_v45 = vrot.slane %v1354_v47, 2  ;;  %v1583_v46 = vmul.f32 0.33333334, %v1517_v24 }
  0xbe   : > { %2246 = vst [vmem:[#allocation29_spill] sm:$0xff] %v1522_v8  ;;  %v662_v16 = vadd.f32 %v1524_v29, %v1522_v8  ;;  %v1559_v22 = vsub.f32 %v1268_v9, %v1543_v56  ;;  %v1563_v18 = vsub.f32 %v1517_v24, %v1543_v56  ;;  %v1567_v42 = vsub.f32 %v1346_v43, %v1543_v56 }
  0xbf   : > { %2248 = vst [vmem:[#allocation31_spill] sm:$0xff] %v1548_v39  ;;  %v167_v1 = vmax.f32 %v123_v17, 0.0  ;;  %v275_v5 = vadd.f32 %v126_v6, %v123_v17  ;;  %v435_v39 = vmul.f32 0.5, %v1517_v24 }
  0xc0   : > { %v1555_v32 = vsub.f32 %v662_v16, %v611_v7  ;;  %v174_v16 = vmax.f32 %v126_v6, 0.0  ;;  %v153_v58 = vmax.f32 %v1563_v18, 0.0  ;;  %v160_v8 = vmax.f32 %v1567_v42, 0.0 }
  0xc1   : > { %963 = vst [vmem:[%s1254_s3 + $0x3e] sm:$0x3] %v167_v1  ;;  %v302_v51 = vadd.f32 %v2250_v45, %v1559_v22  ;;  %v2251_v7 = vrot.slane %v1273_v11, 2  ;;  %v360_v1 = vadd.f32 %v1273_v11, %v126_v6  ;;  %v1596_v45 = vsub.f32 %v1276_v12, %v1517_v24 }
  0xc2   : > { %2249 = vst [vmem:[#allocation32_spill] sm:$0xff] %v1555_v32  ;;  %v147_v32 = vmax.f32 %v1559_v22, 0.0  ;;  %966 = vst [vmem:[%s1254_s3 + $0x4e] sm:$0x3] %v174_v16  ;;  %v425_v16 = vadd.f32 %v1354_v47, %v123_v17  ;;  %v278_v15 = vmul.f32 0.5, %v275_v5  ;;  %v1601_v47 = vsub.f32 %v435_v39, %v1293_v19 }
  0xc3   : > { %v350_v0 = vadd.f32 %v2251_v7, %v1567_v42  ;;  %957 = vst [vmem:[%s1254_s3 + $0x1f] sm:$0x1] %v153_v58  ;;  %960 = vst [vmem:[%s1254_s3 + $0x2f] sm:$0x1] %v160_v8  ;;  %v305_v31 = vmax.f32 %v302_v51, 0.0  ;;  %v363_v8 = vmax.f32 %v360_v1, 0.0  ;;  %v1609_v51 = vsub.f32 %v435_v39, %v1370_v52 }
  0xc4   : > { %150 = vst [vmem:[%s1254_s3 + $0xf] sm:$0x1] %v147_v32  ;;  %v2199_v32 = vrot.slane %v1583_v46, 2  ;;  %v428_v11 = vmax.f32 %v425_v16, 0.0  ;;  %v281_v6 = vmax.f32 %v278_v15, 0.0  ;;  %v2200_v19 = vrot.slane %v1596_v45, 1 }
  0xc5   : > { %v353_v7 = vmax.f32 %v350_v0, 0.0  ;;  %990 = vst [vmem:[%s1254_s3 + $0xcf] sm:$0x1] %v305_v31  ;;  %v1613_v0 = vsub.f32 %v1441_v54, %v1517_v24  ;;  %999 = vst [vmem:[%s1254_s3 + $0xfe] sm:$0x3] %v363_v8  ;;  %v450_v52 = vadd.f32 %v1609_v51, %v1601_v47 }
  0xc6   : > { %v326_v17 = vadd.f32 %v2199_v32, %v1563_v18  ;;  %1011 = vst [vmem:[%s1254_s3 + $0x13e] sm:$0x3] %v428_v11  ;;  %v610_v31 = vmul.f32 0.16666667, %v1517_v24  ;;  %v613_v5 = vmul.f32 0.6666667, %v1517_v24  ;;  %v520_v8 = vadd.f32 %v2200_v19, %v1601_v47 }
  0xc7   : > { %996 = vst [vmem:[%s1254_s3 + $0xef] sm:$0x1] %v353_v7  ;;  %987 = vst [vmem:[%s1254_s3 + $0xbe] sm:$0x3] %v281_v6  ;;  %v468_v54 = vadd.f32 %v1613_v0, %v1596_v45  ;;  %v2201_v16 = vrot.slane %v1613_v0, 1  ;;  %v2252_v11 = vsub.f32 %v1279_v13, %v1256_v3  ;;  %v2255_v19 = vsub.f32 %v1258_v4, %v1276_v12 }
  0xc8   : > { %v329_v1 = vmax.f32 %v326_v17, 0.0  ;;  %v1636_v6 = vsub.f32 %v634_v55, %v610_v31  ;;  %v1639_v17 = vsub.f32 %v450_v52, %v435_v39  ;;  %v2257_v3 = vrot.slane %v1601_v47, 2 }
  0xc9   : > { %v1634_v32 = vsub.f32 %v2252_v11, %v610_v31  ;;  %v1642_v58 = vadd.f32 %v468_v54, %v1517_v24  ;;  %v485_v7 = vadd.f32 %v2201_v16, %v1609_v51  ;;  %v1650_v15 = vadd.f32 %v2255_v19, %v613_v5 }
  0xca   : > { %2254 = vst [vmem:[#allocation34_spill] sm:$0xff] %v1636_v6  ;;  %993 = vst [vmem:[%s1254_s3 + $0xdf] sm:$0x1] %v329_v1  ;;  %v534_v13 = vadd.f32 %v2257_v3, %v520_v8  ;;  %v1656_v39 = vadd.f32 %v658_v38, %v613_v5  ;;  %v2259_v1 = vsub.f32 %v1282_v14, %v1258_v4  ;;  %v2261_v54 = vrot.slane %v1609_v51, 2 }
  0xcb   : > { %2253 = vst [vmem:[#allocation33_spill] sm:$0xff] %v1634_v32  ;;  %2256 = vst [vmem:[#allocation35_spill] sm:$0xff] %v1650_v15  ;;  %v640_v55 = vadd.f32 %v1636_v6, %v1634_v32  ;;  %v2202_v19 = vrot.slane %v1642_v58, 1  ;;  %v2203_v11 = vrot.slane %v1639_v17, 1  ;;  %v2205_v8 = vrot.slane %v1639_v17, 2 }
  0xcc   : > { %2258 = vst [vmem:[#allocation36_spill] sm:$0xff] %v1656_v39  ;;  %v1662_v52 = vsub.f32 %v2259_v1, %v1517_v24  ;;  %v499_v12 = vadd.f32 %v2261_v54, %v485_v7  ;;  %v537_v3 = vmax.f32 %v534_v13, 0.0  ;;  %v664_v16 = vadd.f32 %v1656_v39, %v1650_v15 }
  0xcd   : > { %v2262_v4 = vsub.f32 %v1535_v37, %v1537_v63  ;;  %v555_v1 = vadd.f32 %v2202_v19, %v1639_v17  ;;  %v576_v54 = vadd.f32 %v2203_v11, %v1642_v58  ;;  %v1684_v13 = vadd.f32 %v640_v55, %v610_v31  ;;  %v1708_v31 = vpop.permute.xlu0 %90 }
  0xce   : > { %2260 = vst [vmem:[#allocation37_spill] sm:$0xff] %v1662_v52  ;;  %v502_v7 = vmax.f32 %v499_v12, 0.0  ;;  %1017 = vst [vmem:[%s1254_s3 + $0x17f] sm:$0x1] %v537_v3  ;;  %v1687_v38 = vsub.f32 %v664_v16, %v613_v5  ;;  %v2206_v3 = vrot.slane %v1438_v2, 6  ;;  %v105_v12 = vrot.slane %v1708_v31, 1 }
  0xcf   : > { %v1676_v14 = vsub.f32 %v2262_v4, %v1517_v24  ;;  %2264 = vst [vmem:[#allocation39_spill] sm:$0xff] %v1684_v13  ;;  %v558_v4 = vmax.f32 %v555_v1, 0.0  ;;  %v579_v19 = vmax.f32 %v576_v54, 0.0  ;;  %v594_v11 = vadd.f32 %v2205_v8, %v555_v1 }
  0xd0   : > { %2265 = vst [vmem:[#allocation40_spill] sm:$0xff] %v1687_v38  ;;  %1014 = vst [vmem:[%s1254_s3 + $0x15f] sm:$0x1] %v502_v7  ;;  %v2204_v1 = vrot.slane %v1684_v13, 1  ;;  %v395_v5 = vadd.f32 %v2206_v3, %v1449_v35  ;;  %v2268_v3 = vrot.slane %v1426_v21, 1 }
  0xd1   : > { %2263 = vst [vmem:[#allocation38_spill] sm:$0xff] %v1676_v14  ;;  %v688_v37 = vadd.f32 %v1676_v14, %v1662_v52  ;;  %1020 = vst [vmem:[%s1254_s3 + $0x14f] sm:$0x1] %v558_v4  ;;  %v597_v7 = vmax.f32 %v594_v11, 0.0  ;;  %v1723_v4 = vsub.f32 %v1485_v30, %v1296_v20  ;;  %v2271_v14 = vrot.slane %v1449_v35, 2 }
  0xd2   : > { %1023 = vst [vmem:[%s1254_s3 + $0x16e] sm:$0x3] %v579_v19  ;;  %v1718_v19 = vadd.f32 %v2204_v1, %v1687_v38  ;;  %v398_v8 = vmax.f32 %v395_v5, 0.0  ;;  %v108_v1 = vsel %vm103_vm2, %v105_v12, %v1543_v56 }
  0xd3   : > { %v1698_v55 = vadd.f32 %v688_v37, %v1517_v24  ;;  %1026 = vst [vmem:[%s1254_s3 + $0x18f] sm:$0x1] %v597_v7  ;;  %v1727_v37 = vsub.f32 %v1485_v30, %v1332_v36  ;;  %v106_v7 = vsel %vm103_vm2, %v2268_v3, %v105_v12  ;;  %v1754_v5 = vsub.f32 %v1309_v26, %v108_v1 }
  0xd4   : > { %2267 = vst [vmem:[#allocation42_spill] sm:$0xff] %v1718_v19  ;;  %v2208_v54 = vrot.slane %v1718_v19, 1  ;;  %v112_v36 = vsub.f32 %v1270_v10, %v106_v7  ;;  %1003 = vst [vmem:[%s1254_s3 + $0x10d] sm:$0xf8] %v398_v8  ;;  %v1758_v11 = vsub.f32 %v1426_v21, %v106_v7  ;;  %v1761_v3 = vsub.f32 %v1708_v31, %v108_v1 }
  0xd5   : > { %2266 = vst [vmem:[#allocation41_spill] sm:$0xff] %v1698_v55  ;;  %v448_v20 = vadd.f32 %v1727_v37, %v1723_v4  ;;  %v1764_v56 = vsub.f32 %v1307_v25, %v106_v7  ;;  %v1767_v12 = vsub.f32 %v1348_v44, %v108_v1  ;;  %v1773_v21 = vsub.f32 %v1309_v26, %v1708_v31 }
  0xd6   : > { %v850_v16 = vadd.f32 %v2208_v54, %v1698_v55  ;;  %v1777_v8 = vsub.f32 %v1348_v44, %v1708_v31  ;;  %v129_v25 = vrot.slane %v1708_v31, 7  ;;  %v145_v7 = vmax.f32 %v112_v36, 0.0 }
  0xd7   : > { %v1750_v13 = vsub.f32 %v448_v20, %v1485_v30  ;;  %v146_v1 = vmax.f32 %v1754_v5, 0.0  ;;  %v152_v54 = vmax.f32 %v1761_v3, 0.0  ;;  %v158_v20 = vmax.f32 %v1764_v56, 0.0 }
  0xd8   : > { %v853_v30 = vmax.f32 %v850_v16, 0.0  ;;  %v151_v16 = vmax.f32 %v1758_v11, 0.0  ;;  %v159_v10 = vmax.f32 %v1767_v12, 0.0  ;;  %v130_v63 = vsel %vm127_vm3, %v1434_v60, %v129_v25  ;;  %148 = vst [vmem:[%s1254_s3 - $0x1] sm:$0xfe] %v145_v7 }
  0xd9   : > { %v2269_v19 = vrot.slane %v1517_v24, 7  ;;  %149 = vst [vmem:[%s1254_s3 + $0x7] sm:$0xff] %v146_v1  ;;  %v173_v38 = vmax.f32 %v1777_v8, 0.0  ;;  %v1796_v32 = vsub.f32 %v1309_v26, %v130_v63  ;;  %v1802_v60 = vsub.f32 %v1708_v31, %v130_v63  ;;  %956 = vst [vmem:[%s1254_s3 + $0x17] sm:$0xff] %v152_v54 }
  0xda   : > { %1035 = vst [vmem:[%s1254_s3 + $0x1be] sm:$0x3] %v853_v30  ;;  %v166_v30 = vmax.f32 %v1773_v21, 0.0  ;;  %955 = vst [vmem:[%s1254_s3 + $0xf] sm:$0xfe] %v151_v16  ;;  %v2270_v16 = vrot.slane %v1453_v23, 2 }
  0xdb   : > { %v132_v55 = vsel %vm127_vm3, %v129_v25, %v2269_v19  ;;  %958 = vst [vmem:[%s1254_s3 + $0x1f] sm:$0xfe] %v158_v20  ;;  %959 = vst [vmem:[%s1254_s3 + $0x27] sm:$0xff] %v159_v10  ;;  %v1812_v19 = vsub.f32 %v1348_v44, %v130_v63  ;;  %v180_v54 = vmax.f32 %v1796_v32, 0.0  ;;  %v187_v44 = vmax.f32 %v1802_v60, 0.0 }
  0xdc   : > { %v1799_v52 = vsub.f32 %v1268_v9, %v132_v55  ;;  %v1805_v15 = vsub.f32 %v1517_v24, %v132_v55  ;;  %v1815_v26 = vsub.f32 %v1346_v43, %v132_v55  ;;  %962 = vst [vmem:[%s1254_s3 + $0x36] sm:$0xff] %v166_v30  ;;  %965 = vst [vmem:[%s1254_s3 + $0x46] sm:$0xff] %v173_v38  ;;  %v253_v7 = vrot.slane %v1796_v32, 2 }
  0xdd   : > { %v274_v9 = vadd.f32 %v1777_v8, %v1773_v21  ;;  %v1822_v24 = vadd.f32 %v1400_v27, %v112_v36  ;;  %v194_v63 = vmax.f32 %v1812_v19, 0.0  ;;  %v205_v55 = vrot.slane %v1812_v19, 2  ;;  %968 = vst [vmem:[%s1254_s3 + $0x55] sm:$0xff] %v180_v54  ;;  %971 = vst [vmem:[%s1254_s3 + $0x65] sm:$0xff] %v187_v44 }
  0xde   : > { %v181_v10 = vmax.f32 %v1799_v52, 0.0  ;;  %v188_v43 = vmax.f32 %v1805_v15, 0.0  ;;  %v195_v38 = vmax.f32 %v1815_v26, 0.0  ;;  %v207_v20 = vrot.slane %v1815_v26, 2 }
  0xdf   : > { %v229_v27 = vrot.slane %v1802_v60, 2  ;;  %v231_v25 = vrot.slane %v1805_v15, 2  ;;  %v255_v1 = vrot.slane %v1799_v52, 2  ;;  %974 = vst [vmem:[%s1254_s3 + $0x75] sm:$0xff] %v194_v63  ;;  %v206_v30 = vsel %vm203_vm0, %v2270_v16, %v205_v55 }
  0xe0   : > { %969 = vst [vmem:[%s1254_s3 + $0x5d] sm:$0x7] %v181_v10  ;;  %972 = vst [vmem:[%s1254_s3 + $0x6d] sm:$0x7] %v188_v43  ;;  %v208_v6 = vsel %vm203_vm0, %v205_v55, %v207_v20  ;;  %v214_v54 = vadd.f32 %v207_v20, %v1559_v22  ;;  %v277_v10 = vmul.f32 0.5, %v274_v9  ;;  %v212_v44 = vadd.f32 %v206_v30, %v112_v36 }
  0xe1   : > { %975 = vst [vmem:[%s1254_s3 + $0x7d] sm:$0x7] %v195_v38  ;;  %v213_v43 = vadd.f32 %v208_v6, %v1754_v5  ;;  %v230_v39 = vsel %vm203_vm0, %v2271_v14, %v229_v27  ;;  %v232_v29 = vsel %vm203_vm0, %v229_v27, %v231_v25  ;;  %v238_v55 = vadd.f32 %v231_v25, %v1563_v18 }
  0xe2   : > { %v217_v63 = vmul.f32 0.5, %v214_v54  ;;  %v236_v23 = vadd.f32 %v230_v39, %v1758_v11  ;;  %v237_v38 = vadd.f32 %v232_v29, %v1761_v3  ;;  %v215_v16 = vmul.f32 0.5, %v212_v44 }
  0xe3   : > { %v216_v22 = vmul.f32 0.5, %v213_v43  ;;  %v2272_v36 = vrot.slane %v1445_v28, 2  ;;  %v256_v35 = vsel %vm203_vm0, %v253_v7, %v255_v1  ;;  %v241_v27 = vmul.f32 0.5, %v238_v55 }
  0xe4   : > { %v220_v14 = vmax.f32 %v217_v63, 0.0  ;;  %v239_v9 = vmul.f32 0.5, %v236_v23  ;;  %v240_v20 = vmul.f32 0.5, %v237_v38  ;;  %v218_v39 = vmax.f32 %v215_v16, 0.0 }
  0xe5   : > { %v254_v6 = vsel %vm203_vm0, %v2272_v36, %v253_v7  ;;  %v219_v29 = vmax.f32 %v216_v22, 0.0  ;;  %v261_v25 = vadd.f32 %v256_v35, %v1767_v12  ;;  %v244_v54 = vmax.f32 %v241_v27, 0.0 }
  0xe6   : > { %v260_v18 = vadd.f32 %v254_v6, %v1764_v56  ;;  %978 = vst [vmem:[%s1254_s3 + $0x8f] sm:$0x1] %v220_v14  ;;  %v242_v28 = vmax.f32 %v239_v9, 0.0  ;;  %v243_v30 = vmax.f32 %v240_v20, 0.0  ;;  %v262_v44 = vadd.f32 %v255_v1, %v1567_v42  ;;  %976 = vst [vmem:[%s1254_s3 + $0x7f] sm:$0xfe] %v218_v39 }
  0xe7   : > { %977 = vst [vmem:[%s1254_s3 + $0x87] sm:$0xff] %v219_v29  ;;  %v264_v43 = vmul.f32 0.5, %v261_v25  ;;  %v280_v63 = vmax.f32 %v277_v10, 0.0  ;;  %v301_v23 = vadd.f32 %v1405_v40, %v1754_v5  ;;  %981 = vst [vmem:[%s1254_s3 + $0x9f] sm:$0x1] %v244_v54  ;;  %v303_v55 = vmax.f32 %v1822_v24, 0.0 }
  0xe8   : > { %v263_v7 = vmul.f32 0.5, %v260_v18  ;;  %979 = vst [vmem:[%s1254_s3 + $0x8f] sm:$0xfe] %v242_v28  ;;  %980 = vst [vmem:[%s1254_s3 + $0x97] sm:$0xff] %v243_v30  ;;  %v265_v38 = vmul.f32 0.5, %v262_v44  ;;  %v348_v1 = vadd.f32 %v1360_v49, %v1764_v56  ;;  %v349_v40 = vadd.f32 %v1365_v50, %v1767_v12 }
  0xe9   : > { %v311_v42 = vmul.f32 0.33333334, %v1708_v31  ;;  %v267_v22 = vmax.f32 %v264_v43, 0.0  ;;  %986 = vst [vmem:[%s1254_s3 + $0xb6] sm:$0xff] %v280_v63  ;;  %v304_v10 = vmax.f32 %v301_v23, 0.0  ;;  %v359_v24 = vadd.f32 %v1324_v33, %v1777_v8 }
  0xea   : > { %v266_v16 = vmax.f32 %v263_v7, 0.0  ;;  %v268_v5 = vmax.f32 %v265_v38, 0.0  ;;  %988 = vst [vmem:[%s1254_s3 + $0xbf] sm:$0xfe] %v303_v55  ;;  %v351_v6 = vmax.f32 %v348_v1, 0.0  ;;  %v352_v49 = vmax.f32 %v349_v40, 0.0 }
  0xeb   : > { %v317_v36 = vrot.slane %v311_v42, 2  ;;  %983 = vst [vmem:[%s1254_s3 + $0xa7] sm:$0xff] %v267_v22  ;;  %989 = vst [vmem:[%s1254_s3 + $0xc7] sm:$0xff] %v304_v10  ;;  %v378_v56 = vadd.f32 %v1380_v57, %v1812_v19  ;;  %v379_v50 = vadd.f32 %v1390_v62, %v1815_v26  ;;  %v388_v12 = vrot.slane %v311_v42, 6  ;;  %v2277_v7 = vld [vmem:[#allocation14_spill] sm:$0xff]  ;;  %v2279_v42 = vld [vmem:[#allocation15_spill] sm:$0xff] }
  0xec   : > { %982 = vst [vmem:[%s1254_s3 + $0x9f] sm:$0xfe] %v266_v16  ;;  %984 = vst [vmem:[%s1254_s3 + $0xaf] sm:$0x1] %v268_v5  ;;  %v2273_v35 = vrot.slane %v1438_v2, 2  ;;  %v2274_v33 = vrot.slane %v1583_v46, 2  ;;  %v414_v57 = vadd.f32 %v1408_v53, %v1796_v32  ;;  %v415_v53 = vadd.f32 %v1414_v41, %v1799_v52 }
  0xed   : > { %994 = vst [vmem:[%s1254_s3 + $0xdf] sm:$0xfe] %v351_v6  ;;  %v362_v9 = vmax.f32 %v359_v24, 0.0  ;;  %995 = vst [vmem:[%s1254_s3 + $0xe7] sm:$0xff] %v352_v49  ;;  %v381_v26 = vmax.f32 %v378_v56, 0.0  ;;  %v382_v20 = vmax.f32 %v379_v50, 0.0  ;;  %v458_v41 = vsub.f32 %v1327_v34, %v1708_v31 }
  0xee   : > { %v318_v14 = vsel %vm203_vm0, %v2273_v35, %v317_v36  ;;  %v320_v8 = vsel %vm203_vm0, %v317_v36, %v2274_v33  ;;  %v2275_v27 = vrot.slane %v1438_v2, 6  ;;  %v2276_v29 = vrot.slane %v1583_v46, 6  ;;  %v2280_v1 = vld [vmem:[#allocation12_spill] sm:$0xff]  ;;  %v2282_v5 = vld [vmem:[#allocation22_spill] sm:$0xff]  ;;  %v2285_v50 = vld [vmem:[#allocation23_spill] sm:$0xff] }
  0xef   : > { %v324_v19 = vadd.f32 %v318_v14, %v1758_v11  ;;  %v325_v62 = vadd.f32 %v320_v8, %v1761_v3  ;;  %998 = vst [vmem:[%s1254_s3 + $0xf6] sm:$0xff] %v362_v9  ;;  %v417_v32 = vmax.f32 %v414_v57, 0.0  ;;  %1001 = vst [vmem:[%s1254_s3 + $0x105] sm:$0xff] %v381_v26  ;;  %v418_v28 = vmax.f32 %v415_v53, 0.0 }
  0xf0   : > { %v389_v39 = vsel %vm368_vm1, %v2275_v27, %v388_v12  ;;  %v391_v18 = vsel %vm368_vm1, %v388_v12, %v2276_v29  ;;  %1002 = vst [vmem:[%s1254_s3 + $0x10d] sm:$0x7] %v382_v20  ;;  %v424_v46 = vadd.f32 %v1357_v48, %v1773_v21  ;;  %v434_v30 = vmul.f32 0.5, %v1708_v31  ;;  %v2278_v21 = vld [vmem:[#allocation17_spill] sm:$0xff] }
  0xf1   : > { %v327_v11 = vmax.f32 %v324_v19, 0.0  ;;  %v328_v3 = vmax.f32 %v325_v62, 0.0  ;;  %v396_v25 = vadd.f32 %v389_v39, %v1802_v60  ;;  %v397_v2 = vadd.f32 %v391_v18, %v1805_v15  ;;  %1007 = vst [vmem:[%s1254_s3 + $0x125] sm:$0xff] %v417_v32  ;;  %1008 = vst [vmem:[%s1254_s3 + $0x12d] sm:$0x7] %v418_v28 }
  0xf2   : > { %v464_v15 = vsub.f32 %v1387_v61, %v1708_v31  ;;  %v1924_v60 = vmul.f32 0.16666667, %v1708_v31  ;;  %v427_v44 = vmax.f32 %v424_v46, 0.0  ;;  %v440_v48 = vsub.f32 %v434_v30, %v2277_v7 }
  0xf3   : > { %991 = vst [vmem:[%s1254_s3 + $0xcf] sm:$0xfe] %v327_v11  ;;  %992 = vst [vmem:[%s1254_s3 + $0xd7] sm:$0xff] %v328_v3  ;;  %v399_v52 = vmax.f32 %v396_v25, 0.0  ;;  %v400_v54 = vmax.f32 %v397_v2, 0.0  ;;  %v446_v43 = vsub.f32 %v434_v30, %v2278_v21  ;;  %v511_v63 = vrot.slane %v458_v41, 1 }
  0xf4   : > { %v467_v23 = vadd.f32 %v464_v15, %v458_v41  ;;  %v476_v38 = vrot.slane %v464_v15, 1  ;;  %v1932_v55 = vmul.f32 0.6666667, %v1708_v31  ;;  %v2281_v16 = vsub.f32 %v2279_v42, %v2280_v1  ;;  %1010 = vst [vmem:[%s1254_s3 + $0x136] sm:$0xff] %v427_v44 }
  0xf5   : > { %1004 = vst [vmem:[%s1254_s3 + $0x115] sm:$0xff] %v399_v52  ;;  %1005 = vst [vmem:[%s1254_s3 + $0x11d] sm:$0x7] %v400_v54  ;;  %v449_v10 = vadd.f32 %v446_v43, %v440_v48  ;;  %v490_v40 = vrot.slane %v446_v43, 2  ;;  %v2283_v36 = vrot.slane %v2282_v5, 1  ;;  %v2284_v24 = vrot.slane %v1596_v45, 1 }
  0xf6   : > { %v1938_v22 = vsub.f32 %v2281_v16, %v1924_v60  ;;  %v470_v56 = vadd.f32 %v467_v23, %v1708_v31  ;;  %v2286_v12 = vrot.slane %v2285_v50, 1  ;;  %v2287_v14 = vrot.slane %v1613_v0, 1 }
  0xf7   : > { %v512_v6 = vsel %vm103_vm2, %v2283_v36, %v511_v63  ;;  %v514_v49 = vsel %vm103_vm2, %v511_v63, %v2284_v24  ;;  %v452_v9 = vsub.f32 %v449_v10, %v434_v30  ;;  %v2288_v45 = vrot.slane %v1727_v37, 2 }
  0xf8   : > { %v477_v35 = vsel %vm103_vm2, %v2286_v12, %v476_v38  ;;  %v479_v33 = vsel %vm103_vm2, %v476_v38, %v2287_v14  ;;  %v518_v8 = vadd.f32 %v512_v6, %v1723_v4  ;;  %v2289_v26 = vrot.slane %v1609_v51, 2  ;;  %v2292_v51 = vld [vmem:[#allocation27_spill] sm:$0xff]  ;;  %v2302_v12 = vld [vmem:[#allocation25_spill] sm:$0xff] }
  0xf9   : > { %v483_v57 = vadd.f32 %v477_v35, %v1727_v37  ;;  %v484_v19 = vadd.f32 %v479_v33, %v446_v43  ;;  %v491_v62 = vsel %vm203_vm0, %v2288_v45, %v490_v40  ;;  %v519_v27 = vadd.f32 %v514_v49, %v440_v48  ;;  %v2299_v49 = vld [vmem:[#allocation18_spill] sm:$0xff]  ;;  %v2303_v35 = vld [vmem:[#allocation13_spill] sm:$0xff] }
  0xfa   : > { %v493_v20 = vsel %vm203_vm0, %v490_v40, %v2289_v26  ;;  %v525_v39 = vrot.slane %v440_v48, 2  ;;  %v546_v29 = vrot.slane %v470_v56, 1  ;;  %v567_v53 = vrot.slane %v452_v9, 1 }
  0xfb   : > { %v497_v0 = vadd.f32 %v491_v62, %v483_v57  ;;  %v498_v18 = vadd.f32 %v493_v20, %v484_v19  ;;  %v585_v32 = vrot.slane %v452_v9, 2  ;;  %v2290_v11 = vrot.slane %v1723_v4, 2  ;;  %v2307_v62 = vld [vmem:[#allocation16_spill] sm:$0xff] }
  0xfc   : > { %v2291_v37 = vrot.slane %v1601_v47, 2  ;;  %v2293_v2 = vrot.slane %v2292_v51, 1  ;;  %v2294_v46 = vrot.slane %v1642_v58, 1  ;;  %v2295_v44 = vrot.slane %v1750_v13, 1 }
  0xfd   : > { %v526_v3 = vsel %vm203_vm0, %v2290_v11, %v525_v39  ;;  %v500_v41 = vmax.f32 %v497_v0, 0.0  ;;  %v501_v52 = vmax.f32 %v498_v18, 0.0  ;;  %v2296_v48 = vrot.slane %v1639_v17, 1  ;;  %v2311_v0 = vld [vmem:[#allocation24_spill] sm:$0xff] }
  0xfe   : > { %v528_v25 = vsel %vm203_vm0, %v525_v39, %v2291_v37  ;;  %v547_v28 = vsel %vm103_vm2, %v2293_v2, %v546_v29  ;;  %v549_v30 = vsel %vm103_vm2, %v546_v29, %v2294_v46  ;;  %v532_v4 = vadd.f32 %v526_v3, %v518_v8  ;;  %v2305_v8 = vld [vmem:[#allocation20_spill] sm:$0xff]  ;;  %v2312_v2 = vld [vmem:[#allocation30_spill] sm:$0xff] }
  0xff   : > { %v533_v54 = vadd.f32 %v528_v25, %v519_v27  ;;  %v553_v47 = vadd.f32 %v547_v28, %v1750_v13  ;;  %v554_v15 = vadd.f32 %v549_v30, %v452_v9  ;;  %v568_v7 = vsel %vm103_vm2, %v2295_v44, %v567_v53  ;;  %1012 = vst [vmem:[%s1254_s3 + $0x14f] sm:$0xfe] %v500_v41  ;;  %v2309_v27 = vld [vmem:[#allocation21_spill] sm:$0xff]  ;;  %v2314_v30 = vld [vmem:[#allocation36_spill] sm:$0xff] }
 0x100   : > { %v570_v58 = vsel %vm103_vm2, %v567_v53, %v2296_v48  ;;  %1013 = vst [vmem:[%s1254_s3 + $0x157] sm:$0xff] %v501_v52  ;;  %v535_v21 = vmax.f32 %v532_v4, 0.0  ;;  %v574_v63 = vadd.f32 %v568_v7, %v2292_v51  ;;  %v2297_v1 = vrot.slane %v1750_v13, 2 }
 0x101   : > { %v536_v43 = vmax.f32 %v533_v54, 0.0  ;;  %v575_v23 = vadd.f32 %v570_v58, %v470_v56  ;;  %v556_v38 = vmax.f32 %v553_v47, 0.0  ;;  %v557_v42 = vmax.f32 %v554_v15, 0.0  ;;  %v2300_v56 = vld [vmem:[#allocation19_spill] sm:$0xff] }
 0x102   : > { %v586_v16 = vsel %vm203_vm0, %v2297_v1, %v585_v32  ;;  %v2298_v10 = vrot.slane %v1639_v17, 2  ;;  %1015 = vst [vmem:[%s1254_s3 + $0x16f] sm:$0xfe] %v535_v21  ;;  %v577_v5 = vmax.f32 %v574_v63, 0.0  ;;  %v2301_v13 = vsub.f32 %v2299_v49, %v2300_v56  ;;  %v2323_v1 = vld [vmem:[#allocation34_spill] sm:$0xff] }
 0x103   : > { %1016 = vst [vmem:[%s1254_s3 + $0x177] sm:$0xff] %v536_v43  ;;  %v578_v36 = vmax.f32 %v575_v23, 0.0  ;;  %v592_v6 = vadd.f32 %v586_v16, %v553_v47  ;;  %1018 = vst [vmem:[%s1254_s3 + $0x13f] sm:$0xfe] %v556_v38  ;;  %v638_v17 = vadd.f32 %v1500_v59, %v2302_v12  ;;  %v2304_v14 = vsub.f32 %v2303_v35, %v1327_v34 }
 0x104   : > { %v588_v40 = vsel %vm203_vm0, %v585_v32, %v2298_v10  ;;  %1019 = vst [vmem:[%s1254_s3 + $0x147] sm:$0xff] %v557_v42  ;;  %v636_v50 = vsub.f32 %v2301_v13, %v1924_v60  ;;  %v2306_v9 = vsub.f32 %v2305_v8, %v1387_v61  ;;  %1021 = vst [vmem:[%s1254_s3 + $0x15e] sm:$0xfc] %v577_v5  ;;  %v2313_v28 = vrot.slane %v2312_v2, 1 }
 0x105   : > { %v593_v24 = vadd.f32 %v588_v40, %v554_v15  ;;  %v651_v33 = vadd.f32 %v2304_v14, %v1932_v55  ;;  %1022 = vst [vmem:[%s1254_s3 + $0x166] sm:$0xff] %v578_v36  ;;  %v595_v19 = vmax.f32 %v592_v6, 0.0  ;;  %v2308_v26 = vsub.f32 %v2307_v62, %v2303_v35  ;;  %v2316_v15 = vld [vmem:[#allocation28_spill] sm:$0xff]  ;;  %v2325_v40 = vld [vmem:[#allocation29_spill] sm:$0xff]  ;;  %v2326_v35 = vld [vmem:[#allocation35_spill] sm:$0xff] }
 0x106   : > { %v660_v57 = vadd.f32 %v2306_v9, %v1932_v55  ;;  %v2310_v39 = vsub.f32 %v2309_v27, %v2305_v8  ;;  %v639_v29 = vadd.f32 %v636_v50, %v1938_v22  ;;  %v2020_v18 = vadd.f32 %v638_v17, %v2311_v0  ;;  %v2328_v9 = vld [vmem:[#allocation26_spill] sm:$0xff] }
 0x107   : > { %v596_v45 = vmax.f32 %v593_v24, 0.0  ;;  %v675_v20 = vsub.f32 %v2308_v26, %v1708_v31  ;;  %1024 = vst [vmem:[%s1254_s3 + $0x17f] sm:$0xfe] %v595_v19  ;;  %v731_v37 = vrot.slane %v636_v50, 4  ;;  %v2315_v41 = vrot.slane %v2314_v30, 1 }
 0x108   : > { %v684_v34 = vsub.f32 %v2310_v39, %v1708_v31  ;;  %v663_v61 = vadd.f32 %v660_v57, %v651_v33  ;;  %v696_v53 = vrot.slane %v660_v57, 1  ;;  %v718_v3 = vrot.slane %v660_v57, 3 }
 0x109   : > { %1025 = vst [vmem:[%s1254_s3 + $0x187] sm:$0xff] %v596_v45  ;;  %v642_v25 = vadd.f32 %v639_v29, %v1924_v60  ;;  %v2317_v44 = vrot.slane %v2316_v15, 2  ;;  %v2320_v58 = vrot.slane %v2312_v2, 3  ;;  %v2321_v43 = vrot.slane %v2314_v30, 3  ;;  %v2330_v45 = vld [vmem:[#allocation37_spill] sm:$0xff] }
 0x10a   : > { %v687_v32 = vadd.f32 %v684_v34, %v675_v20  ;;  %v708_v11 = vrot.slane %v684_v34, 2  ;;  %v2026_v51 = vsub.f32 %v663_v61, %v1932_v55  ;;  %v697_v46 = vsel %vm103_vm2, %v2313_v28, %v696_v53  ;;  %v2318_v55 = vld [vmem:[#allocation38_spill] sm:$0xff] }
 0x10b   : > { %v699_v52 = vsel %vm103_vm2, %v696_v53, %v2315_v41  ;;  %v702_v54 = vadd.f32 %v697_v46, %v1500_v59  ;;  %v2319_v7 = vrot.slane %v2318_v55, 2  ;;  %v719_v21 = vsel %vm716_vm4, %v2320_v58, %v718_v3  ;;  %v2333_v53 = vld [vmem:[#allocation33_spill] sm:$0xff]  ;;  %v2335_v46 = vld [vmem:[#allocation32_spill] sm:$0xff] }
 0x10c   : > { %v2035_v4 = vadd.f32 %v687_v32, %v1708_v31  ;;  %v703_v47 = vadd.f32 %v699_v52, %v636_v50  ;;  %v709_v60 = vsel %vm203_vm0, %v2317_v44, %v708_v11  ;;  %v721_v31 = vsel %vm716_vm4, %v718_v3, %v2321_v43  ;;  %v2336_v44 = vld [vmem:[#allocation40_spill] sm:$0xff] }
 0x10d   : > { %v711_v48 = vsel %vm203_vm0, %v708_v11, %v2319_v7  ;;  %v2322_v63 = vrot.slane %v1500_v59, 4  ;;  %v714_v38 = vadd.f32 %v709_v60, %v702_v54  ;;  %v2324_v16 = vrot.slane %v2323_v1, 4  ;;  %v2338_v7 = vld [vmem:[#allocation31_spill] sm:$0xff] }
 0x10e   : > { %v715_v42 = vadd.f32 %v711_v48, %v703_v47  ;;  %v747_v5 = vrot.slane %v2325_v40, 1  ;;  %v748_v36 = vrot.slane %v651_v33, 1  ;;  %v760_v6 = vrot.slane %v675_v20, 2 }
 0x10f   : > { %v732_v23 = vsel %vm729_vm5, %v2322_v63, %v731_v37  ;;  %v734_v10 = vsel %vm729_vm5, %v731_v37, %v2324_v16  ;;  %v768_v24 = vrot.slane %v2325_v40, 3  ;;  %v769_v49 = vrot.slane %v651_v33, 3  ;;  %v2342_v16 = vld [vmem:[#allocation39_spill] sm:$0xff] }
 0x110   : > { %v724_v56 = vadd.f32 %v719_v21, %v714_v38  ;;  %v725_v13 = vadd.f32 %v721_v31, %v715_v42  ;;  %v780_v50 = vrot.slane %v2302_v12, 4  ;;  %v781_v59 = vrot.slane %v1938_v22, 4  ;;  %v2340_v21 = vld [vmem:[#allocation41_spill] sm:$0xff] }
 0x111   : > { %v749_v17 = vsel %vm103_vm2, %v747_v5, %v748_v36  ;;  %v2327_v14 = vrot.slane %v2326_v35, 1  ;;  %v2329_v57 = vrot.slane %v2328_v9, 2  ;;  %v2331_v62 = vrot.slane %v2330_v45, 2 }
 0x112   : > { %v737_v26 = vadd.f32 %v732_v23, %v724_v56  ;;  %v738_v20 = vadd.f32 %v734_v10, %v725_v13  ;;  %v754_v27 = vadd.f32 %v749_v17, %v2302_v12  ;;  %v770_v34 = vsel %vm716_vm4, %v768_v24, %v769_v49 }
 0x113   : > { %v751_v8 = vsel %vm103_vm2, %v748_v36, %v2327_v14  ;;  %v761_v19 = vsel %vm203_vm0, %v2329_v57, %v760_v6  ;;  %v763_v33 = vsel %vm203_vm0, %v760_v6, %v2331_v62  ;;  %v2332_v29 = vrot.slane %v2326_v35, 3 }
 0x114   : > { %v755_v39 = vadd.f32 %v751_v8, %v1938_v22  ;;  %v782_v61 = vsel %vm729_vm5, %v780_v50, %v781_v59  ;;  %v2334_v32 = vrot.slane %v2333_v53, 4  ;;  %v739_v3 = vmax.f32 %v737_v26, 0.0 }
 0x115   : > { %v772_v0 = vsel %vm716_vm4, %v769_v49, %v2332_v29  ;;  %v740_v37 = vmax.f32 %v738_v20, 0.0  ;;  %v766_v2 = vadd.f32 %v761_v19, %v754_v27  ;;  %v797_v12 = vrot.slane %v2335_v46, 1  ;;  %v2344_v49 = vld [vmem:[#allocation42_spill] sm:$0xff] }
 0x116   : > { %v784_v11 = vsel %vm729_vm5, %v781_v59, %v2334_v32  ;;  %v767_v28 = vadd.f32 %v763_v33, %v755_v39  ;;  %v798_v22 = vrot.slane %v2026_v51, 1  ;;  %v810_v30 = vrot.slane %v2035_v4, 2  ;;  %1027 = vst [vmem:[%s1254_s3 + $0x1a0] sm:$0xff] %v739_v3 }
 0x117   : > { %v822_v41 = vrot.slane %v642_v25, 1  ;;  %1028 = vst [vmem:[%s1254_s3 + $0x1a8] sm:$0xff] %v740_v37  ;;  %v775_v52 = vadd.f32 %v770_v34, %v766_v2  ;;  %v821_v47 = vrot.slane %v2020_v18, 1  ;;  %v2337_v60 = vrot.slane %v2336_v44, 1 }
 0x118   : > { %v776_v54 = vadd.f32 %v772_v0, %v767_v28  ;;  %v799_v15 = vsel %vm103_vm2, %v797_v12, %v798_v22  ;;  %v2339_v48 = vrot.slane %v2338_v7, 2  ;;  %v2341_v43 = vrot.slane %v2340_v21, 2 }
 0x119   : > { %v801_v55 = vsel %vm103_vm2, %v798_v22, %v2337_v60  ;;  %v787_v63 = vadd.f32 %v782_v61, %v775_v52  ;;  %v804_v38 = vadd.f32 %v799_v15, %v2020_v18  ;;  %v823_v1 = vsel %vm103_vm2, %v821_v47, %v822_v41 }
 0x11a   : > { %v811_v58 = vsel %vm203_vm0, %v2339_v48, %v810_v30  ;;  %v813_v31 = vsel %vm203_vm0, %v810_v30, %v2341_v43  ;;  %v788_v23 = vadd.f32 %v784_v11, %v776_v54  ;;  %v805_v42 = vadd.f32 %v801_v55, %v642_v25 }
 0x11b   : > { %v2343_v10 = vrot.slane %v2342_v16, 1  ;;  %v789_v5 = vmax.f32 %v787_v63, 0.0  ;;  %v816_v6 = vadd.f32 %v811_v58, %v804_v38  ;;  %v861_v56 = vrot.slane %v2344_v49, 3 }
 0x11c   : > { %v790_v36 = vmax.f32 %v788_v23, 0.0  ;;  %v817_v24 = vadd.f32 %v813_v31, %v805_v42  ;;  %v829_v13 = vadd.f32 %v823_v1, %v2335_v46  ;;  %v2345_v9 = vrot.slane %v2344_v49, 1 }
 0x11d   : > { %v825_v40 = vsel %vm103_vm2, %v822_v41, %v2343_v10  ;;  %1029 = vst [vmem:[%s1254_s3 + $0x1c0] sm:$0xff] %v789_v5  ;;  %v832_v25 = vmax.f32 %v816_v6, 0.0 }
 0x11e   : > { %v830_v18 = vadd.f32 %v825_v40, %v2026_v51  ;;  %1030 = vst [vmem:[%s1254_s3 + $0x1c8] sm:$0xff] %v790_v36  ;;  %v833_v50 = vmax.f32 %v817_v24, 0.0  ;;  %v840_v59 = vrot.slane %v829_v13, 1  ;;  %v858_v35 = vrot.slane %v829_v13, 3 }
 0x11f   : > { %1031 = vst [vmem:[%s1254_s3 + $0x190] sm:$0xff] %v832_v25 }
 0x120   : > { %v841_v17 = vrot.slane %v830_v18, 1  ;;  %v859_v14 = vrot.slane %v830_v18, 3  ;;  %1032 = vst [vmem:[%s1254_s3 + $0x198] sm:$0xff] %v833_v50 }
 0x122   : > { %v842_v8 = vsel %vm103_vm2, %v840_v59, %v841_v17  ;;  %v844_v51 = vsel %vm103_vm2, %v841_v17, %v2345_v9  ;;  %v860_v57 = vsel %vm716_vm4, %v858_v35, %v859_v14  ;;  %v862_v19 = vsel %vm716_vm4, %v859_v14, %v861_v56 }
 0x123   : > { %v848_v45 = vadd.f32 %v842_v8, %v2338_v7  ;;  %v849_v62 = vadd.f32 %v844_v51, %v2035_v4  ;;  %v865_v33 = vadd.f32 %v860_v57, %v816_v6  ;;  %v866_v26 = vadd.f32 %v862_v19, %v817_v24 }
 0x125   : > { %v851_v20 = vmax.f32 %v848_v45, 0.0  ;;  %v852_v27 = vmax.f32 %v849_v62, 0.0  ;;  %v867_v39 = vmax.f32 %v865_v33, 0.0  ;;  %v868_v34 = vmax.f32 %v866_v26, 0.0 }
 0x127   : > { %1033 = vst [vmem:[%s1254_s3 + $0x1ae] sm:$0xfc] %v851_v20  ;;  %1034 = vst [vmem:[%s1254_s3 + $0x1b6] sm:$0xff] %v852_v27 }
 0x128   : > { %1036 = vst [vmem:[%s1254_s3 + $0x1d0] sm:$0xff] %v867_v39  ;;  %1037 = vst [vmem:[%s1254_s3 + $0x1d8] sm:$0xff] %v868_v34 }
 0x129   : > { %1128 = shalt.err (!%p1125_p1)
}
 0x12a   : > { %s1129_s17 = scalar_lea.hbm %s2121_s20, 7680  ;;  %s1133_s28 = scalar_lea.hbm %s2172_s1, 15360 }
 0x12b   : > { %p1130_p2 = scmp.ne.s32.totalorder %s2121_s20, %s1129_s17  ;;  %p1134_p5 = scmp.lt.u32.totalorder %s2121_s20, %s2172_s1 }
 0x12c   : > { %p1135_p8 = scmp.lt.u32.totalorder %s1133_s28, %s1129_s17  ;;  %p1137_p10 = scmp.lt.u32.totalorder %s1129_s17, %s2121_s20 }
 0x12d   : > { %p1131_p3 = pnand %p1130_p2, %p1236_p7 }
 0x12e   : > { %p1136_p9 = por %p1135_p8, %p1134_p5 }
 0x12f   : > { %p1132_p4 = pneg %p1131_p3 }
 0x130   : > { %p1138_p11 = por %p1137_p10, %p1136_p9 }
 0x132   : > { %p1139_p12 = pnand %p1138_p11, %p1132_p4 }
 0x134   : > { %1142 = shalt.err (!%p1139_p12)
}
 0x135   : > { %s1187_s2 = smov 128   ;;  %s1188_s3 = smov 8  }
 0x136   : > { %1045 = dma.vmem_to_hbm [thread:$0]  (%p1236_p7), %s2123_s18, 7680, %s2121_s20, %s2131_s21, %s1187_s2, %s1187_s2, %s1188_s3  }
 0x137 PF: > { %p1051_p13 = scmp.ge.s32.totalorder %s1179_s9, 1  ;;  %s903_s4 = sand.u32 1, %s1167_s6  }
 0x138   : > { %s904_s5 = scalar_lea.sflag [#allocation5], %s903_s4 }
 0x139   : > { %p1048_p0 = pnand %p1051_p13, %p1229_p6 }
 0x13b   : > { %1162 = dma.done.wait (!%p1048_p0), %s904_s5, 7680  }
 0x13c   : > { %1164 = vsyncadd (!%p1048_p0), %s904_s5, 4294959616  ;;  %s14_s9 = sadd.s32 1, %s1179_s9   ;;  %s2346_s6 = smov %s1171_s7 }
 0x13d   : > { %p11_p1 = scmp.ge.s32.totalorder %s14_s9, 3   ;;  %s2347_s7 = smov %s1234_s15 }
 0x13e   : > { %s2348_s8 = smov %s2350_s10 }
 0x13f   :  { %13 = sbr.rel (!%p11_p1) target bundleno = 3 (0x3), region = 78 }
 0x146   :  { %909 = vsyncpa [#allocation5], 1 }
 0x147   :  { %911 = vsyncpa [#allocation5 + $0x1], 1 }
 0x148   :  { %912 = vsyncmov [#allocation3] }
 0x14b   :  { %s913_s14 = vpop.sfrf %912 }
 0x14c   :  { %p1041_p6 = scmp.ne.s32.totalorder %s913_s14, 0 }
 0x14e   :  { %917 = shalt.err (%p1041_p6)  }

</bundles_post_ra>
